<compile_context>
chip_gen: v5e
topology: v5e:2x2
jax: 0.10.0
libtpu: 0.0.40
codegen_flags: <defaults>
</compile_context>

<pallas_src>
import functools

import jax
import jax.numpy as jnp
from jax.experimental import pallas as pl
from jax.experimental.pallas import tpu as pltpu

_VMEM = pl.BlockSpec(memory_space=pltpu.MemorySpace.VMEM)


def _default_vmem_limit():
    """Generation-aware scoped-VMEM limit: leave headroom below physical capacity."""
    try:
        cap = pltpu.get_tpu_info().vmem_capacity_bytes
    except Exception:
        cap = 64 * 1024 * 1024                      # conservative (v7x-sized) fallback
    if cap >= 128 * 1024 * 1024:                    # v5e / v6e: 128 MiB physical
        return 100 * 1024 * 1024
    return 48 * 1024 * 1024                         # v7x: 64 MiB physical


_VMEM_LIMIT = _default_vmem_limit()


# ------------------------------ tiling helpers ------------------------------

def _pick_tile(dim, target, unit):
    """Largest multiple of `unit` <= target that divides dim, else the full dim."""
    if dim <= target:
        return dim
    t = (target // unit) * unit
    while t >= unit:
        if dim % t == 0:
            return t
        t -= unit
    return dim


def _head_group_width(hd, dh):
    """Head-group width: multiple of Dh that is lane-dense (mult of 128) or == Hd."""
    if hd % 128 != 0:
        return hd
    g = dh
    while g % 128 != 0:
        g += dh
    return g if hd % g == 0 else hd


# --------------------------- fused tiled matmul -----------------------------

def _fused_matmul_kernel(*refs, k_axis, acc_steps, act, has_res, has_ln, eps):
    x_ref, w_ref, b_ref = refs[0], refs[1], refs[2]
    i = 3
    res_ref = None
    if has_res:
        res_ref = refs[i]
        i += 1
    g_ref = beta_ref = None
    if has_ln:
        g_ref, beta_ref = refs[i], refs[i + 1]
        i += 2
    o_ref, acc_ref = refs[i], refs[i + 1]

    kk = pl.program_id(k_axis)

    @pl.when(kk == 0)
    def _():
        acc_ref[...] = jnp.zeros_like(acc_ref)

    acc_ref[...] += jnp.dot(
        x_ref[...].astype(jnp.bfloat16),
        w_ref[...].astype(jnp.bfloat16),
        preferred_element_type=jnp.float32)

    @pl.when(kk == acc_steps - 1)
    def _():
        y = acc_ref[...] + b_ref[...]
        if act == "gelu":  # exact (erf) GELU, matching HF BERT
            y = 0.5 * y * (1.0 + jax.lax.erf(y * 0.7071067811865476))
        if has_res:
            y = y + res_ref[...]
        if has_ln:
            mu = jnp.mean(y, axis=-1, keepdims=True)
            yc = y - mu
            var = jnp.mean(yc * yc, axis=-1, keepdims=True)
            y = yc * jax.lax.rsqrt(var + eps) * g_ref[...] + beta_ref[...]
        o_ref[...] = y.astype(o_ref.dtype)


def fused_matmul(x, w, b, *, act=None, residual=None, ln=None, eps=1e-12,
                 out_dtype=jnp.float32):
    """out = epilogue(x @ w + b); epilogue = gelu and/or (residual add + LayerNorm)."""
    M, K = x.shape
    K2, N = w.shape
    assert K == K2
    tk = _pick_tile(K, 512, 128)
    if ln is not None:
        # LN needs the full output row -> single N tile; cap tm at M/2 so the grid
        # keeps >= 2 parallel tiles for v7x's two TensorCores.
        tn = N
        tm = _pick_tile(M, min(1024, max(8, M // 2)), 8)
    else:
        tn = _pick_tile(N, 512, 128)
        tm = _pick_tile(M, 1024, 8)
    grid = (M // tm, N // tn, K // tk)

    in_specs = [
        pl.BlockSpec((tm, tk), lambda i, j, k: (i, k)),
        pl.BlockSpec((tk, tn), lambda i, j, k: (k, j)),
        pl.BlockSpec((1, tn), lambda i, j, k: (0, j)),
    ]
    inputs = [x, w, b.reshape(1, N)]
    if residual is not None:
        in_specs.append(pl.BlockSpec((tm, tn), lambda i, j, k: (i, j)))
        inputs.append(residual)
    if ln is not None:
        g, beta = ln
        in_specs += [pl.BlockSpec((1, tn), lambda i, j, k: (0, j)),
                     pl.BlockSpec((1, tn), lambda i, j, k: (0, j))]
        inputs += [g.reshape(1, N), beta.reshape(1, N)]

    cost = pl.CostEstimate(
        flops=2 * M * N * K,
        transcendentals=M * N if act == "gelu" else 0,
        bytes_accessed=(x.dtype.itemsize * M * K + 2 * K * N
                        + jnp.dtype(out_dtype).itemsize * M * N + 4 * M * N))

    return pl.pallas_call(
        functools.partial(_fused_matmul_kernel, k_axis=2, acc_steps=grid[2],
                          act=act, has_res=residual is not None,
                          has_ln=ln is not None, eps=eps),
        out_shape=jax.ShapeDtypeStruct((M, N), out_dtype),
        grid=grid,
        in_specs=in_specs,
        out_specs=pl.BlockSpec((tm, tn), lambda i, j, k: (i, j)),
        scratch_shapes=[pltpu.VMEM((tm, tn), jnp.float32)],
        compiler_params=pltpu.CompilerParams(
            dimension_semantics=("parallel", "parallel", "arbitrary"),
            vmem_limit_bytes=_VMEM_LIMIT),
        cost_estimate=cost,
    )(*inputs)


def qkv_matmul(x, w_qkv, b_qkv, *, out_dtype=jnp.bfloat16):
    """Single-launch fused Q/K/V projection.  x:(M,K) w_qkv:(3,K,N) -> (3,M,N)."""
    M, K = x.shape
    _, K2, N = w_qkv.shape
    assert K == K2
    tm = _pick_tile(M, 1024, 8)
    tk = _pick_tile(K, 512, 128)
    tn = _pick_tile(N, 512, 128)
    grid = (3, M // tm, N // tn, K // tk)

    cost = pl.CostEstimate(
        flops=2 * 3 * M * N * K, transcendentals=0,
        bytes_accessed=(x.dtype.itemsize * M * K + 6 * K * N
                        + 3 * jnp.dtype(out_dtype).itemsize * M * N))

    return pl.pallas_call(
        functools.partial(_fused_matmul_kernel, k_axis=3, acc_steps=grid[3],
                          act=None, has_res=False, has_ln=False, eps=0.0),
        out_shape=jax.ShapeDtypeStruct((3, M, N), out_dtype),
        grid=grid,
        in_specs=[
            pl.BlockSpec((tm, tk), lambda t, i, j, k: (i, k)),
            pl.BlockSpec((None, tk, tn), lambda t, i, j, k: (t, k, j)),
            pl.BlockSpec((None, 1, tn), lambda t, i, j, k: (t, 0, j)),
        ],
        out_specs=pl.BlockSpec((None, tm, tn), lambda t, i, j, k: (t, i, j)),
        scratch_shapes=[pltpu.VMEM((tm, tn), jnp.float32)],
        compiler_params=pltpu.CompilerParams(
            dimension_semantics=("parallel", "parallel", "parallel", "arbitrary"),
            vmem_limit_bytes=_VMEM_LIMIT),
        cost_estimate=cost,
    )(x, w_qkv, b_qkv.reshape(3, 1, N))


# -------------------------------- LayerNorm ---------------------------------

def _layernorm_kernel(x_ref, g_ref, b_ref, o_ref, *, eps):
    x = x_ref[...]
    mu = jnp.mean(x, axis=-1, keepdims=True)
    xc = x - mu
    var = jnp.mean(xc * xc, axis=-1, keepdims=True)
    o_ref[...] = xc * jax.lax.rsqrt(var + eps) * g_ref[...] + b_ref[...]


def layernorm(x, g, b, eps=1e-12):
    M, N = x.shape
    tm = _pick_tile(M, min(1024, max(8, M // 2)), 8)   # keep >= 2 parallel tiles
    return pl.pallas_call(
        functools.partial(_layernorm_kernel, eps=eps),
        out_shape=jax.ShapeDtypeStruct((M, N), jnp.float32),
        grid=(M // tm,),
        in_specs=[pl.BlockSpec((tm, N), lambda i: (i, 0)),
                  pl.BlockSpec((1, N), lambda i: (0, 0)),
                  pl.BlockSpec((1, N), lambda i: (0, 0))],
        out_specs=pl.BlockSpec((tm, N), lambda i: (i, 0)),
        compiler_params=pltpu.CompilerParams(
            dimension_semantics=("parallel",), vmem_limit_bytes=_VMEM_LIMIT),
    )(x, g.reshape(1, N), b.reshape(1, N))


# ------------------------------- attention ----------------------------------

def _attn_kernel(q_ref, k_ref, v_ref, m_ref, o_ref, *, dh, hpg, scale):
    mbias = m_ref[...]                                        # (1, S) additive bias
    # NOTE: batching the hpg Dh-deep contractions into one MXU push (block-diag mask)
    # would raise MXU utilization on v6e/v7x; deferred — attention is a minority of
    # total FLOPs at BERT-base.
    for h in range(hpg):                                      # static head loop within group
        q = q_ref[:, h * dh:(h + 1) * dh].astype(jnp.bfloat16)
        k = k_ref[:, h * dh:(h + 1) * dh].astype(jnp.bfloat16)
        v = v_ref[:, h * dh:(h + 1) * dh].astype(jnp.bfloat16)
        s = jax.lax.dot_general(q, k, (((1,), (1,)), ((), ())),
                                preferred_element_type=jnp.float32) * scale  # (S, S)
        s = s + mbias                                         # broadcast over query rows
        s = s - jnp.max(s, axis=-1, keepdims=True)
        p = jnp.exp(s)                                        # f32 softmax math
        p = p * pl.reciprocal(jnp.sum(p, axis=-1, keepdims=True), approx=True)
        out_h = jnp.dot(p.astype(jnp.bfloat16), v, preferred_element_type=jnp.float32)
        # direct per-head store into the output slice: no concat, no extra VMEM copy
        o_ref[:, h * dh:(h + 1) * dh] = out_h.astype(o_ref.dtype)


def mha(qkv, mask_bias, *, n_heads, out_dtype=jnp.bfloat16):
    # qkv: (3, B, S, Hd) packed q/k/v ; mask_bias: (B, 1, S) additive (0 / -1e4)
    _, B, S, Hd = qkv.shape
    Dh = Hd // n_heads
    G = _head_group_width(Hd, Dh)                 # lane-dense head-group width
    hpg = G // Dh
    nG = Hd // G
    scale = 1.0 / float(Dh) ** 0.5

    q_spec = pl.BlockSpec((None, None, S, G), lambda b, g: (0, b, 0, g))
    k_spec = pl.BlockSpec((None, None, S, G), lambda b, g: (1, b, 0, g))
    v_spec = pl.BlockSpec((None, None, S, G), lambda b, g: (2, b, 0, g))
    m_spec = pl.BlockSpec((None, 1, S), lambda b, g: (b, 0, 0))
    o_spec = pl.BlockSpec((None, S, G), lambda b, g: (b, 0, g))

    return pl.pallas_call(
        functools.partial(_attn_kernel, dh=Dh, hpg=hpg, scale=scale),
        out_shape=jax.ShapeDtypeStruct((B, S, Hd), out_dtype),
        grid=(B, nG),
        in_specs=[q_spec, k_spec, v_spec, m_spec],
        out_specs=o_spec,
        compiler_params=pltpu.CompilerParams(
            dimension_semantics=("parallel", "parallel"),
            vmem_limit_bytes=_VMEM_LIMIT),
    )(qkv, qkv, qkv, mask_bias)


# ---------------------- fused biLSTM (1 step) + final fc ---------------------

def _lstm_fc_kernel(x_ref, wg_ref, bg_ref, wf_ref, bf_ref, o_ref, *, hid):
    # Gate layout per direction: [input, cell(g), output]; the forget gate is
    # dropped because it multiplies c0 == 0 for this length-1 sequence
    # (weight_hh is likewise inert since h0 == 0).
    g = jnp.dot(x_ref[...].astype(jnp.bfloat16), wg_ref[...].astype(jnp.bfloat16),
                preferred_element_type=jnp.float32) + bg_ref[...]

    def cell(off):
        i_g = jax.nn.sigmoid(g[:, off + 0 * hid: off + 1 * hid])
        c_b = jnp.tanh(g[:, off + 1 * hid: off + 2 * hid])
        o_g = jax.nn.sigmoid(g[:, off + 2 * hid: off + 3 * hid])
        return o_g * jnp.tanh(i_g * c_b)

    h = jnp.concatenate([cell(0), cell(3 * hid)], axis=-1)     # (B, 2*hid)
    # N=1 output: VPU broadcast-multiply + row reduce (no 1-column MXU matmul,
    # no lane-masked store path for the result column).
    o_ref[...] = jnp.sum(h * wf_ref[...], axis=-1, keepdims=True) + bf_ref[...]


def lstm_fc(cls, w_gates, b_gates, fc_w, fc_b):
    B, _ = cls.shape
    hid = w_gates.shape[1] // 6
    return pl.pallas_call(
        functools.partial(_lstm_fc_kernel, hid=hid),
        out_shape=jax.ShapeDtypeStruct((B, 1), jnp.float32),
        in_specs=[_VMEM] * 5,
        out_specs=_VMEM,
        compiler_params=pltpu.CompilerParams(vmem_limit_bytes=_VMEM_LIMIT),
    )(cls, w_gates, b_gates.reshape(1, -1), fc_w.reshape(1, -1), fc_b.reshape(1, 1))


# ------------------------------ model wrapper --------------------------------

def init_params(key, cfg):
    Hd, I, L = cfg["hidden"], cfg["intermediate"], cfg["layers"]
    hid = cfg["lstm_hidden"]

    def nrm(k, shape):
        return 0.02 * jax.random.normal(k, shape, dtype=jnp.float32)

    keys = iter(jax.random.split(key, 64))
    p = {
        "word_emb": nrm(next(keys), (cfg["vocab"], Hd)),
        "pos_emb": nrm(next(keys), (cfg["max_pos"], Hd)),
        "type_emb": nrm(next(keys), (2, Hd)),
        "emb_ln_g": jnp.ones((Hd,), jnp.float32),
        "emb_ln_b": jnp.zeros((Hd,), jnp.float32),
        "layers": [],
    }
    for _ in range(L):
        wq, wk, wv = nrm(next(keys), (Hd, Hd)), nrm(next(keys), (Hd, Hd)), nrm(next(keys), (Hd, Hd))
        p["layers"].append({
            # stacked Q/K/V weights (bf16 storage halves weight DMA; f32 accumulation)
            "wqkv": jnp.stack([wq, wk, wv]).astype(jnp.bfloat16),
            "bqkv": jnp.zeros((3, Hd), jnp.float32),
            "wo": nrm(next(keys), (Hd, Hd)).astype(jnp.bfloat16),
            "bo": jnp.zeros((Hd,), jnp.float32),
            "ln1_g": jnp.ones((Hd,), jnp.float32), "ln1_b": jnp.zeros((Hd,), jnp.float32),
            "w1": nrm(next(keys), (Hd, I)).astype(jnp.bfloat16),
            "b1": jnp.zeros((I,), jnp.float32),
            "w2": nrm(next(keys), (I, Hd)).astype(jnp.bfloat16),
            "b2": jnp.zeros((Hd,), jnp.float32),
            "ln2_g": jnp.ones((Hd,), jnp.float32), "ln2_b": jnp.zeros((Hd,), jnp.float32),
        })

    # LSTM: PyTorch layout is weight_ih_l0 (4*hid, Hd) with gate order [i, f, g, o].
    # We keep only the i/g/o columns (the forget gate multiplies c0 == 0).
    def igo_cols(w_ih_t):                      # (Hd, 4*hid) -> (Hd, 3*hid)
        return jnp.concatenate([w_ih_t[:, 0 * hid:1 * hid],
                                w_ih_t[:, 2 * hid:3 * hid],
                                w_ih_t[:, 3 * hid:4 * hid]], axis=1)

    w_ih_f = nrm(next(keys), (Hd, 4 * hid))
    w_ih_b = nrm(next(keys), (Hd, 4 * hid))
    p["lstm"] = {
        "w_gates": jnp.concatenate([igo_cols(w_ih_f), igo_cols(w_ih_b)],
                                   axis=1).astype(jnp.bfloat16),      # (Hd, 6*hid)
        "b_gates": jnp.zeros((6 * hid,), jnp.float32),                # b_ih + b_hh
    }
    p["fc_w"] = nrm(next(keys), (2 * hid, 1))
    p["fc_b"] = jnp.zeros((1,), jnp.float32)
    return p


def bert_lstm_forward(params, input_ids, attention_mask, cfg):
    B, S = input_ids.shape
    Hd, nH = cfg["hidden"], cfg["heads"]

    # --- embeddings (gathers are glue, done in plain JAX) ---
    emb = (params["word_emb"][input_ids]
           + params["pos_emb"][:S][None, :, :]
           + params["type_emb"][0][None, None, :])            # token_type_ids = 0
    x = layernorm(emb.reshape(B * S, Hd), params["emb_ln_g"], params["emb_ln_b"])

    # precomputed additive attention-mask bias: 0 = keep, -10000 = masked
    mask_bias = (attention_mask.astype(jnp.float32) - 1.0).reshape(B, 1, S) * 10000.0

    for layer in params["layers"]:
        # Q/K/V in one launch; output stays bf16 (matmul-LHS-only intermediate).
        qkv = qkv_matmul(x, layer["wqkv"], layer["bqkv"])            # (3, B*S, Hd) bf16
        ctx = mha(qkv.reshape(3, B, S, Hd), mask_bias, n_heads=nH)   # (B, S, Hd) bf16
        # attention output projection with fused bias + residual + LayerNorm (f32 out)
        x = fused_matmul(ctx.reshape(B * S, Hd), layer["wo"], layer["bo"],
                         residual=x, ln=(layer["ln1_g"], layer["ln1_b"]))
        # FFN: GELU fused into matmul-1 (bf16 out); bias + residual + LN in matmul-2
        h = fused_matmul(x, layer["w1"], layer["b1"], act="gelu",
                         out_dtype=jnp.bfloat16)
        x = fused_matmul(h, layer["w2"], layer["b2"],
                         residual=x, ln=(layer["ln2_g"], layer["ln2_b"]))

    cls = x.reshape(B, S, Hd)[:, 0, :]                         # (B, Hd)

    # bidirectional LSTM over a length-1 sequence + final fc, fused in one kernel
    return lstm_fc(cls, params["lstm"]["w_gates"], params["lstm"]["b_gates"],
                   params["fc_w"], params["fc_b"])             # (B, 1)


# ----------------------------------- main ------------------------------------

if __name__ == "__main__":
    cfg = dict(hidden=32, heads=2, layers=2, intermediate=64,
               vocab=64, max_pos=16, lstm_hidden=32)
    key = jax.random.PRNGKey(0)
    pkey, ikey = jax.random.split(key)
    params = init_params(pkey, cfg)

    B, S = 2, 8
    input_ids = jax.random.randint(ikey, (B, S), 0, cfg["vocab"], dtype=jnp.int32)
    attention_mask = jnp.ones((B, S), dtype=jnp.int32)

    fwd = jax.jit(functools.partial(bert_lstm_forward, cfg=cfg))
    out = fwd(params, input_ids, attention_mask)
    out = jax.block_until_ready(out)
    assert out.shape == (B, 1) and out.dtype == jnp.float32
    print("KERNEL_OK")
</pallas_src>

<mosaic_0001>
module attributes {stable_mosaic.version = 11 : i64} {
  func.func @_layernorm_kernel(%arg0: i32, %arg1: memref<8x32xf32, #tpu.memory_space<vmem>>, %arg2: memref<1x32xf32, #tpu.memory_space<vmem>>, %arg3: memref<1x32xf32, #tpu.memory_space<vmem>>, %arg4: memref<8x32xf32, #tpu.memory_space<vmem>>) attributes {dimension_semantics = [#tpu.dimension_semantics<parallel>], iteration_bounds = array<i64: 2>, scalar_prefetch = 0 : i64, scratch_operands = 0 : i64, tpu.core_type = #tpu.core_type<tc>, window_params = [{transform_indices = @transform_0, window_bounds = array<i64: 8, 32>}, {pipeline_mode = #tpu.pipeline_mode<synchronous>, transform_indices = @transform_1, window_bounds = array<i64: 1, 32>}, {pipeline_mode = #tpu.pipeline_mode<synchronous>, transform_indices = @transform_2, window_bounds = array<i64: 1, 32>}, {transform_indices = @transform_3, window_bounds = array<i64: 8, 32>}]} {
    %c0 = arith.constant 0 : index
    %c0_0 = arith.constant 0 : index
    %0 = vector.load %arg1[%c0, %c0_0] : memref<8x32xf32, #tpu.memory_space<vmem>>, vector<8x32xf32>
    %cst = arith.constant dense<0.000000e+00> : vector<8xf32>
    %1 = vector.multi_reduction <add>, %0, %cst [1] : vector<8x32xf32> to vector<8xf32>
    %2 = vector.shape_cast %1 : vector<8xf32> to vector<8x1xf32>
    %cst_1 = arith.constant 3.200000e+01 : f32
    %3 = vector.broadcast %cst_1 : f32 to vector<8x1xf32>
    %4 = arith.divf %2, %3 : vector<8x1xf32>
    %5 = vector.broadcast %4 : vector<8x1xf32> to vector<8x32xf32>
    %6 = arith.subf %0, %5 : vector<8x32xf32>
    %7 = arith.mulf %6, %6 : vector<8x32xf32>
    %cst_2 = arith.constant dense<0.000000e+00> : vector<8xf32>
    %8 = vector.multi_reduction <add>, %7, %cst_2 [1] : vector<8x32xf32> to vector<8xf32>
    %9 = vector.shape_cast %8 : vector<8xf32> to vector<8x1xf32>
    %cst_3 = arith.constant 3.200000e+01 : f32
    %10 = vector.broadcast %cst_3 : f32 to vector<8x1xf32>
    %11 = arith.divf %9, %10 : vector<8x1xf32>
    %cst_4 = arith.constant 9.99999996E-13 : f32
    %12 = vector.broadcast %cst_4 : f32 to vector<8x1xf32>
    %13 = arith.addf %11, %12 : vector<8x1xf32>
    %14 = math.rsqrt %13 : vector<8x1xf32>
    %15 = vector.broadcast %14 : vector<8x1xf32> to vector<8x32xf32>
    %16 = arith.mulf %6, %15 : vector<8x32xf32>
    %c0_5 = arith.constant 0 : index
    %c0_6 = arith.constant 0 : index
    %17 = vector.load %arg2[%c0_5, %c0_6] : memref<1x32xf32, #tpu.memory_space<vmem>>, vector<1x32xf32>
    %18 = vector.broadcast %17 : vector<1x32xf32> to vector<8x32xf32>
    %19 = arith.mulf %16, %18 : vector<8x32xf32>
    %c0_7 = arith.constant 0 : index
    %c0_8 = arith.constant 0 : index
    %20 = vector.load %arg3[%c0_7, %c0_8] : memref<1x32xf32, #tpu.memory_space<vmem>>, vector<1x32xf32>
    %21 = vector.broadcast %20 : vector<1x32xf32> to vector<8x32xf32>
    %22 = arith.addf %19, %21 : vector<8x32xf32>
    %c0_9 = arith.constant 0 : index
    %c0_10 = arith.constant 0 : index
    %23 = vector.load %arg4[%c0_9, %c0_10] : memref<8x32xf32, #tpu.memory_space<vmem>>, vector<8x32xf32>
    tpu.vector_store %arg4[%c0_9, %c0_10], %22 {strides = array<i32>} : memref<8x32xf32, #tpu.memory_space<vmem>>, vector<8x32xf32>,
    return
  }
  func.func @transform_0(%arg0: i32) -> (i32, i32) {
    %c0_i32 = arith.constant 0 : i32
    %c0_i32_0 = arith.constant 0 : i32
    return %arg0, %c0_i32 : i32, i32
  }
  func.func @transform_1(%arg0: i32) -> (i32, i32) {
    %c0_i32 = arith.constant 0 : i32
    %c0_i32_0 = arith.constant 0 : i32
    %c0_i32_1 = arith.constant 0 : i32
    return %c0_i32, %c0_i32_0 : i32, i32
  }
  func.func @transform_2(%arg0: i32) -> (i32, i32) {
    %c0_i32 = arith.constant 0 : i32
    %c0_i32_0 = arith.constant 0 : i32
    %c0_i32_1 = arith.constant 0 : i32
    return %c0_i32, %c0_i32_0 : i32, i32
  }
  func.func @transform_3(%arg0: i32) -> (i32, i32) {
    %c0_i32 = arith.constant 0 : i32
    %c0_i32_0 = arith.constant 0 : i32
    return %arg0, %c0_i32 : i32, i32
  }
}

module attributes {stable_mosaic.version = 11 : i64} {
  func.func @_fused_matmul_kernel(%arg0: i32, %arg1: i32, %arg2: i32, %arg3: i32, %arg4: memref<16x32xf32, #tpu.memory_space<vmem>>, %arg5: memref<1x32x32xbf16, #tpu.memory_space<vmem>>, %arg6: memref<1x1x32xf32, #tpu.memory_space<vmem>>, %arg7: memref<1x16x32xbf16, #tpu.memory_space<vmem>>, %arg8: memref<16x32xf32, #tpu.memory_space<vmem>>) attributes {dimension_semantics = [#tpu.dimension_semantics<parallel>, #tpu.dimension_semantics<parallel>, #tpu.dimension_semantics<parallel>, #tpu.dimension_semantics<arbitrary>], iteration_bounds = array<i64: 3, 1, 1, 1>, scalar_prefetch = 0 : i64, scratch_operands = 1 : i64, tpu.core_type = #tpu.core_type<tc>, window_params = [{transform_indices = @transform_0, window_bounds = array<i64: 16, 32>}, {transform_indices = @transform_1, window_bounds = array<i64: 1, 32, 32>}, {transform_indices = @transform_2, window_bounds = array<i64: 1, 1, 32>}, {transform_indices = @transform_3, window_bounds = array<i64: 1, 16, 32>}]} {
    %c0_i32 = arith.constant 0 : i32
    %0 = arith.cmpi eq, %arg3, %c0_i32 : i32
    %1 = arith.extui %0 : i1 to i32
    %c0_i32_0 = arith.constant 0 : i32
    %2 = arith.cmpi ne, %1, %c0_i32_0 : i32
    scf.if %2 {
      %cst_11 = arith.constant 0.000000e+00 : f32
      %14 = vector.broadcast %cst_11 : f32 to vector<16x32xf32>
      %c0_12 = arith.constant 0 : index
      %c0_13 = arith.constant 0 : index
      %15 = vector.load %arg8[%c0_12, %c0_13] : memref<16x32xf32, #tpu.memory_space<vmem>>, vector<16x32xf32>
      tpu.vector_store %arg8[%c0_12, %c0_13], %14 {strides = array<i32>} : memref<16x32xf32, #tpu.memory_space<vmem>>, vector<16x32xf32>,
    } else {
    }
    %c0 = arith.constant 0 : index
    %c0_1 = arith.constant 0 : index
    %3 = vector.load %arg8[%c0, %c0_1] : memref<16x32xf32, #tpu.memory_space<vmem>>, vector<16x32xf32>
    %c0_2 = arith.constant 0 : index
    %c0_3 = arith.constant 0 : index
    %4 = vector.load %arg4[%c0_2, %c0_3] : memref<16x32xf32, #tpu.memory_space<vmem>>, vector<16x32xf32>
    %5 = arith.truncf %4 : vector<16x32xf32> to vector<16x32xbf16>
    %c0_4 = arith.constant 0 : index
    %c0_5 = arith.constant 0 : index
    %c0_6 = arith.constant 0 : index
    %6 = vector.load %arg5[%c0_4, %c0_5, %c0_6] : memref<1x32x32xbf16, #tpu.memory_space<vmem>>, vector<1x32x32xbf16>
    %7 = vector.shape_cast %6 : vector<1x32x32xbf16> to vector<32x32xbf16>
    %cst = arith.constant dense<0.000000e+00> : vector<16x32xf32>
    %8 = tpu.matmul %5, %7, %cst {dimension_numbers = #tpu.dot_dimension_numbers<[1], [0], [0], [1], [0, 0, 1, 1], [], []>} : vector<16x32xbf16>, vector<32x32xbf16>, vector<16x32xf32> -> vector<16x32xf32>
    %9 = arith.addf %3, %8 : vector<16x32xf32>
    %c0_7 = arith.constant 0 : index
    %c0_8 = arith.constant 0 : index
    %10 = vector.load %arg8[%c0_7, %c0_8] : memref<16x32xf32, #tpu.memory_space<vmem>>, vector<16x32xf32>
    tpu.vector_store %arg8[%c0_7, %c0_8], %9 {strides = array<i32>} : memref<16x32xf32, #tpu.memory_space<vmem>>, vector<16x32xf32>,
    %c0_i32_9 = arith.constant 0 : i32
    %11 = arith.cmpi eq, %arg3, %c0_i32_9 : i32
    %12 = arith.extui %11 : i1 to i32
    %c0_i32_10 = arith.constant 0 : i32
    %13 = arith.cmpi ne, %12, %c0_i32_10 : i32
    scf.if %13 {
      %c0_11 = arith.constant 0 : index
      %c0_12 = arith.constant 0 : index
      %14 = vector.load %arg8[%c0_11, %c0_12] : memref<16x32xf32, #tpu.memory_space<vmem>>, vector<16x32xf32>
      %c0_13 = arith.constant 0 : index
      %c0_14 = arith.constant 0 : index
      %c0_15 = arith.constant 0 : index
      %15 = vector.load %arg6[%c0_13, %c0_14, %c0_15] : memref<1x1x32xf32, #tpu.memory_space<vmem>>, vector<1x1x32xf32>
      %16 = vector.shape_cast %15 : vector<1x1x32xf32> to vector<1x32xf32>
      %17 = vector.broadcast %16 : vector<1x32xf32> to vector<16x32xf32>
      %18 = arith.addf %14, %17 : vector<16x32xf32>
      %19 = arith.truncf %18 : vector<16x32xf32> to vector<16x32xbf16>
      %c0_16 = arith.constant 0 : index
      %c0_17 = arith.constant 0 : index
      %c0_18 = arith.constant 0 : index
      %20 = vector.load %arg7[%c0_16, %c0_17, %c0_18] : memref<1x16x32xbf16, #tpu.memory_space<vmem>>, vector<1x16x32xbf16>
      %21 = vector.shape_cast %20 : vector<1x16x32xbf16> to vector<16x32xbf16>
      %22 = vector.shape_cast %19 : vector<16x32xbf16> to vector<1x16x32xbf16>
      tpu.vector_store %arg7[%c0_16, %c0_17, %c0_18], %22 {strides = array<i32>} : memref<1x16x32xbf16, #tpu.memory_space<vmem>>, vector<1x16x32xbf16>,
    } else {
    }
    return
  }
  func.func @transform_0(%arg0: i32, %arg1: i32, %arg2: i32, %arg3: i32) -> (i32, i32) {
    %c0_i32 = arith.constant 0 : i32
    return %arg1, %arg3 : i32, i32
  }
  func.func @transform_1(%arg0: i32, %arg1: i32, %arg2: i32, %arg3: i32) -> (i32, i32, i32) {
    %c0_i32 = arith.constant 0 : i32
    return %arg0, %arg3, %arg2 : i32, i32, i32
  }
  func.func @transform_2(%arg0: i32, %arg1: i32, %arg2: i32, %arg3: i32) -> (i32, i32, i32) {
    %c0_i32 = arith.constant 0 : i32
    %c0_i32_0 = arith.constant 0 : i32
    return %arg0, %c0_i32, %arg2 : i32, i32, i32
  }
  func.func @transform_3(%arg0: i32, %arg1: i32, %arg2: i32, %arg3: i32) -> (i32, i32, i32) {
    %c0_i32 = arith.constant 0 : i32
    return %arg0, %arg1, %arg2 : i32, i32, i32
  }
}

module attributes {stable_mosaic.version = 11 : i64} {
  func.func @_attn_kernel(%arg0: i32, %arg1: i32, %arg2: memref<1x1x8x32xbf16, #tpu.memory_space<vmem>>, %arg3: memref<1x1x8x32xbf16, #tpu.memory_space<vmem>>, %arg4: memref<1x1x8x32xbf16, #tpu.memory_space<vmem>>, %arg5: memref<1x1x8xf32, #tpu.memory_space<vmem>>, %arg6: memref<1x8x32xbf16, #tpu.memory_space<vmem>>) attributes {dimension_semantics = [#tpu.dimension_semantics<parallel>, #tpu.dimension_semantics<parallel>], iteration_bounds = array<i64: 2, 1>, scalar_prefetch = 0 : i64, scratch_operands = 0 : i64, tpu.core_type = #tpu.core_type<tc>, window_params = [{transform_indices = @transform_0, window_bounds = array<i64: 1, 1, 8, 32>}, {transform_indices = @transform_1, window_bounds = array<i64: 1, 1, 8, 32>}, {transform_indices = @transform_2, window_bounds = array<i64: 1, 1, 8, 32>}, {transform_indices = @transform_3, window_bounds = array<i64: 1, 1, 8>}, {transform_indices = @transform_4, window_bounds = array<i64: 1, 8, 32>}]} {
    %c0 = arith.constant 0 : index
    %c0_0 = arith.constant 0 : index
    %c0_1 = arith.constant 0 : index
    %0 = vector.load %arg5[%c0, %c0_0, %c0_1] : memref<1x1x8xf32, #tpu.memory_space<vmem>>, vector<1x1x8xf32>
    %1 = vector.shape_cast %0 : vector<1x1x8xf32> to vector<1x8xf32>
    %c0_2 = arith.constant 0 : index
    %c0_3 = arith.constant 0 : index
    %c0_4 = arith.constant 0 : index
    %c0_5 = arith.constant 0 : index
    %2 = vector.load %arg2[%c0_2, %c0_3, %c0_4, %c0_5] : memref<1x1x8x32xbf16, #tpu.memory_space<vmem>>, vector<1x1x8x16xbf16>
    %3 = vector.shape_cast %2 : vector<1x1x8x16xbf16> to vector<8x16xbf16>
    %c0_6 = arith.constant 0 : index
    %c0_7 = arith.constant 0 : index
    %c0_8 = arith.constant 0 : index
    %c0_9 = arith.constant 0 : index
    %4 = vector.load %arg3[%c0_6, %c0_7, %c0_8, %c0_9] : memref<1x1x8x32xbf16, #tpu.memory_space<vmem>>, vector<1x1x8x16xbf16>
    %5 = vector.shape_cast %4 : vector<1x1x8x16xbf16> to vector<8x16xbf16>
    %c0_10 = arith.constant 0 : index
    %c0_11 = arith.constant 0 : index
    %c0_12 = arith.constant 0 : index
    %c0_13 = arith.constant 0 : index
    %6 = vector.load %arg4[%c0_10, %c0_11, %c0_12, %c0_13] : memref<1x1x8x32xbf16, #tpu.memory_space<vmem>>, vector<1x1x8x16xbf16>
    %7 = vector.shape_cast %6 : vector<1x1x8x16xbf16> to vector<8x16xbf16>
    %cst = arith.constant dense<0.000000e+00> : vector<8x8xf32>
    %8 = tpu.matmul %3, %5, %cst {dimension_numbers = #tpu.dot_dimension_numbers<[1], [1], [0], [0], [0, 0, 1, 0], [], []>} : vector<8x16xbf16>, vector<8x16xbf16>, vector<8x8xf32> -> vector<8x8xf32>
    %cst_14 = arith.constant 2.500000e-01 : f32
    %9 = vector.broadcast %cst_14 : f32 to vector<8x8xf32>
    %10 = arith.mulf %8, %9 : vector<8x8xf32>
    %11 = vector.broadcast %1 : vector<1x8xf32> to vector<8x8xf32>
    %12 = arith.addf %10, %11 : vector<8x8xf32>
    %cst_15 = arith.constant dense<0xFF800000> : vector<8xf32>
    %13 = vector.multi_reduction <maximumf>, %12, %cst_15 [1] : vector<8x8xf32> to vector<8xf32>
    %14 = vector.shape_cast %13 : vector<8xf32> to vector<8x1xf32>
    %15 = vector.broadcast %14 : vector<8x1xf32> to vector<8x8xf32>
    %16 = arith.subf %12, %15 : vector<8x8xf32>
    %17 = math.exp %16 : vector<8x8xf32>
    %cst_16 = arith.constant dense<0.000000e+00> : vector<8xf32>
    %18 = vector.multi_reduction <add>, %17, %cst_16 [1] : vector<8x8xf32> to vector<8xf32>
    %19 = vector.shape_cast %18 : vector<8xf32> to vector<8x1xf32>
    %20 = tpu.reciprocal %19 {approx = true} : vector<8x1xf32> -> vector<8x1xf32>
    %21 = vector.broadcast %20 : vector<8x1xf32> to vector<8x8xf32>
    %22 = arith.mulf %17, %21 : vector<8x8xf32>
    %23 = arith.truncf %22 : vector<8x8xf32> to vector<8x8xbf16>
    %cst_17 = arith.constant dense<0.000000e+00> : vector<8x16xf32>
    %24 = tpu.matmul %23, %7, %cst_17 {dimension_numbers = #tpu.dot_dimension_numbers<[1], [0], [0], [1], [0, 0, 1, 1], [], []>} : vector<8x8xbf16>, vector<8x16xbf16>, vector<8x16xf32> -> vector<8x16xf32>
    %25 = arith.truncf %24 : vector<8x16xf32> to vector<8x16xbf16>
    %c0_18 = arith.constant 0 : index
    %c0_19 = arith.constant 0 : index
    %c0_20 = arith.constant 0 : index
    %26 = vector.load %arg6[%c0_18, %c0_19, %c0_20] : memref<1x8x32xbf16, #tpu.memory_space<vmem>>, vector<1x8x16xbf16>
    %27 = vector.shape_cast %26 : vector<1x8x16xbf16> to vector<8x16xbf16>
    %28 = vector.shape_cast %25 : vector<8x16xbf16> to vector<1x8x16xbf16>
    tpu.vector_store %arg6[%c0_18, %c0_19, %c0_20], %28 {strides = array<i32>} : memref<1x8x32xbf16, #tpu.memory_space<vmem>>, vector<1x8x16xbf16>,
    %c0_21 = arith.constant 0 : index
    %c0_22 = arith.constant 0 : index
    %c0_23 = arith.constant 0 : index
    %c16 = arith.constant 16 : index
    %29 = vector.load %arg2[%c0_21, %c0_22, %c0_23, %c16] : memref<1x1x8x32xbf16, #tpu.memory_space<vmem>>, vector<1x1x8x16xbf16>
    %30 = vector.shape_cast %29 : vector<1x1x8x16xbf16> to vector<8x16xbf16>
    %c0_24 = arith.constant 0 : index
    %c0_25 = arith.constant 0 : index
    %c0_26 = arith.constant 0 : index
    %c16_27 = arith.constant 16 : index
    %31 = vector.load %arg3[%c0_24, %c0_25, %c0_26, %c16_27] : memref<1x1x8x32xbf16, #tpu.memory_space<vmem>>, vector<1x1x8x16xbf16>
    %32 = vector.shape_cast %31 : vector<1x1x8x16xbf16> to vector<8x16xbf16>
    %c0_28 = arith.constant 0 : index
    %c0_29 = arith.constant 0 : index
    %c0_30 = arith.constant 0 : index
    %c16_31 = arith.constant 16 : index
    %33 = vector.load %arg4[%c0_28, %c0_29, %c0_30, %c16_31] : memref<1x1x8x32xbf16, #tpu.memory_space<vmem>>, vector<1x1x8x16xbf16>
    %34 = vector.shape_cast %33 : vector<1x1x8x16xbf16> to vector<8x16xbf16>
    %cst_32 = arith.constant dense<0.000000e+00> : vector<8x8xf32>
    %35 = tpu.matmul %30, %32, %cst_32 {dimension_numbers = #tpu.dot_dimension_numbers<[1], [1], [0], [0], [0, 0, 1, 0], [], []>} : vector<8x16xbf16>, vector<8x16xbf16>, vector<8x8xf32> -> vector<8x8xf32>
    %cst_33 = arith.constant 2.500000e-01 : f32
    %36 = vector.broadcast %cst_33 : f32 to vector<8x8xf32>
    %37 = arith.mulf %35, %36 : vector<8x8xf32>
    %38 = vector.broadcast %1 : vector<1x8xf32> to vector<8x8xf32>
    %39 = arith.addf %37, %38 : vector<8x8xf32>
    %cst_34 = arith.constant dense<0xFF800000> : vector<8xf32>
    %40 = vector.multi_reduction <maximumf>, %39, %cst_34 [1] : vector<8x8xf32> to vector<8xf32>
    %41 = vector.shape_cast %40 : vector<8xf32> to vector<8x1xf32>
    %42 = vector.broadcast %41 : vector<8x1xf32> to vector<8x8xf32>
    %43 = arith.subf %39, %42 : vector<8x8xf32>
    %44 = math.exp %43 : vector<8x8xf32>
    %cst_35 = arith.constant dense<0.000000e+00> : vector<8xf32>
    %45 = vector.multi_reduction <add>, %44, %cst_35 [1] : vector<8x8xf32> to vector<8xf32>
    %46 = vector.shape_cast %45 : vector<8xf32> to vector<8x1xf32>
    %47 = tpu.reciprocal %46 {approx = true} : vector<8x1xf32> -> vector<8x1xf32>
    %48 = vector.broadcast %47 : vector<8x1xf32> to vector<8x8xf32>
    %49 = arith.mulf %44, %48 : vector<8x8xf32>
    %50 = arith.truncf %49 : vector<8x8xf32> to vector<8x8xbf16>
    %cst_36 = arith.constant dense<0.000000e+00> : vector<8x16xf32>
    %51 = tpu.matmul %50, %34, %cst_36 {dimension_numbers = #tpu.dot_dimension_numbers<[1], [0], [0], [1], [0, 0, 1, 1], [], []>} : vector<8x8xbf16>, vector<8x16xbf16>, vector<8x16xf32> -> vector<8x16xf32>
    %52 = arith.truncf %51 : vector<8x16xf32> to vector<8x16xbf16>
    %c0_37 = arith.constant 0 : index
    %c0_38 = arith.constant 0 : index
    %c16_39 = arith.constant 16 : index
    %53 = vector.load %arg6[%c0_37, %c0_38, %c16_39] : memref<1x8x32xbf16, #tpu.memory_space<vmem>>, vector<1x8x16xbf16>
    %54 = vector.shape_cast %53 : vector<1x8x16xbf16> to vector<8x16xbf16>
    %55 = vector.shape_cast %52 : vector<8x16xbf16> to vector<1x8x16xbf16>
    tpu.vector_store %arg6[%c0_37, %c0_38, %c16_39], %55 {strides = array<i32>} : memref<1x8x32xbf16, #tpu.memory_space<vmem>>, vector<1x8x16xbf16>,
    return
  }
  func.func @transform_0(%arg0: i32, %arg1: i32) -> (i32, i32, i32, i32) {
    %c0_i32 = arith.constant 0 : i32
    %c0_i32_0 = arith.constant 0 : i32
    %c0_i32_1 = arith.constant 0 : i32
    return %c0_i32, %arg0, %c0_i32_0, %arg1 : i32, i32, i32, i32
  }
  func.func @transform_1(%arg0: i32, %arg1: i32) -> (i32, i32, i32, i32) {
    %c1_i32 = arith.constant 1 : i32
    %c0_i32 = arith.constant 0 : i32
    %c0_i32_0 = arith.constant 0 : i32
    return %c1_i32, %arg0, %c0_i32, %arg1 : i32, i32, i32, i32
  }
  func.func @transform_2(%arg0: i32, %arg1: i32) -> (i32, i32, i32, i32) {
    %c2_i32 = arith.constant 2 : i32
    %c0_i32 = arith.constant 0 : i32
    %c0_i32_0 = arith.constant 0 : i32
    return %c2_i32, %arg0, %c0_i32, %arg1 : i32, i32, i32, i32
  }
  func.func @transform_3(%arg0: i32, %arg1: i32) -> (i32, i32, i32) {
    %c0_i32 = arith.constant 0 : i32
    %c0_i32_0 = arith.constant 0 : i32
    %c0_i32_1 = arith.constant 0 : i32
    return %arg0, %c0_i32, %c0_i32_0 : i32, i32, i32
  }
  func.func @transform_4(%arg0: i32, %arg1: i32) -> (i32, i32, i32) {
    %c0_i32 = arith.constant 0 : i32
    %c0_i32_0 = arith.constant 0 : i32
    return %arg0, %c0_i32, %arg1 : i32, i32, i32
  }
}

module attributes {stable_mosaic.version = 11 : i64} {
  func.func @_fused_matmul_kernel(%arg0: i32, %arg1: i32, %arg2: i32, %arg3: memref<8x32xbf16, #tpu.memory_space<vmem>>, %arg4: memref<32x32xbf16, #tpu.memory_space<vmem>>, %arg5: memref<1x32xf32, #tpu.memory_space<vmem>>, %arg6: memref<8x32xf32, #tpu.memory_space<vmem>>, %arg7: memref<1x32xf32, #tpu.memory_space<vmem>>, %arg8: memref<1x32xf32, #tpu.memory_space<vmem>>, %arg9: memref<8x32xf32, #tpu.memory_space<vmem>>, %arg10: memref<8x32xf32, #tpu.memory_space<vmem>>) attributes {dimension_semantics = [#tpu.dimension_semantics<parallel>, #tpu.dimension_semantics<parallel>, #tpu.dimension_semantics<arbitrary>], iteration_bounds = array<i64: 2, 1, 1>, scalar_prefetch = 0 : i64, scratch_operands = 1 : i64, tpu.core_type = #tpu.core_type<tc>, window_params = [{transform_indices = @transform_0, window_bounds = array<i64: 8, 32>}, {transform_indices = @transform_1, window_bounds = array<i64: 32, 32>}, {transform_indices = @transform_2, window_bounds = array<i64: 1, 32>}, {transform_indices = @transform_3, window_bounds = array<i64: 8, 32>}, {transform_indices = @transform_4, window_bounds = array<i64: 1, 32>}, {transform_indices = @transform_5, window_bounds = array<i64: 1, 32>}, {transform_indices = @transform_6, window_bounds = array<i64: 8, 32>}]} {
    %c0_i32 = arith.constant 0 : i32
    %0 = arith.cmpi eq, %arg2, %c0_i32 : i32
    %1 = arith.extui %0 : i1 to i32
    %c0_i32_0 = arith.constant 0 : i32
    %2 = arith.cmpi ne, %1, %c0_i32_0 : i32
    scf.if %2 {
      %cst_10 = arith.constant 0.000000e+00 : f32
      %12 = vector.broadcast %cst_10 : f32 to vector<8x32xf32>
      %c0_11 = arith.constant 0 : index
      %c0_12 = arith.constant 0 : index
      %13 = vector.load %arg10[%c0_11, %c0_12] : memref<8x32xf32, #tpu.memory_space<vmem>>, vector<8x32xf32>
      tpu.vector_store %arg10[%c0_11, %c0_12], %12 {strides = array<i32>} : memref<8x32xf32, #tpu.memory_space<vmem>>, vector<8x32xf32>,
    } else {
    }
    %c0 = arith.constant 0 : index
    %c0_1 = arith.constant 0 : index
    %3 = vector.load %arg10[%c0, %c0_1] : memref<8x32xf32, #tpu.memory_space<vmem>>, vector<8x32xf32>
    %c0_2 = arith.constant 0 : index
    %c0_3 = arith.constant 0 : index
    %4 = vector.load %arg3[%c0_2, %c0_3] : memref<8x32xbf16, #tpu.memory_space<vmem>>, vector<8x32xbf16>
    %c0_4 = arith.constant 0 : index
    %c0_5 = arith.constant 0 : index
    %5 = vector.load %arg4[%c0_4, %c0_5] : memref<32x32xbf16, #tpu.memory_space<vmem>>, vector<32x32xbf16>
    %cst = arith.constant dense<0.000000e+00> : vector<8x32xf32>
    %6 = tpu.matmul %4, %5, %cst {dimension_numbers = #tpu.dot_dimension_numbers<[1], [0], [0], [1], [0, 0, 1, 1], [], []>} : vector<8x32xbf16>, vector<32x32xbf16>, vector<8x32xf32> -> vector<8x32xf32>
    %7 = arith.addf %3, %6 : vector<8x32xf32>
    %c0_6 = arith.constant 0 : index
    %c0_7 = arith.constant 0 : index
    %8 = vector.load %arg10[%c0_6, %c0_7] : memref<8x32xf32, #tpu.memory_space<vmem>>, vector<8x32xf32>
    tpu.vector_store %arg10[%c0_6, %c0_7], %7 {strides = array<i32>} : memref<8x32xf32, #tpu.memory_space<vmem>>, vector<8x32xf32>,
    %c0_i32_8 = arith.constant 0 : i32
    %9 = arith.cmpi eq, %arg2, %c0_i32_8 : i32
    %10 = arith.extui %9 : i1 to i32
    %c0_i32_9 = arith.constant 0 : i32
    %11 = arith.cmpi ne, %10, %c0_i32_9 : i32
    scf.if %11 {
      %c0_10 = arith.constant 0 : index
      %c0_11 = arith.constant 0 : index
      %12 = vector.load %arg10[%c0_10, %c0_11] : memref<8x32xf32, #tpu.memory_space<vmem>>, vector<8x32xf32>
      %c0_12 = arith.constant 0 : index
      %c0_13 = arith.constant 0 : index
      %13 = vector.load %arg5[%c0_12, %c0_13] : memref<1x32xf32, #tpu.memory_space<vmem>>, vector<1x32xf32>
      %14 = vector.broadcast %13 : vector<1x32xf32> to vector<8x32xf32>
      %15 = arith.addf %12, %14 : vector<8x32xf32>
      %c0_14 = arith.constant 0 : index
      %c0_15 = arith.constant 0 : index
      %16 = vector.load %arg6[%c0_14, %c0_15] : memref<8x32xf32, #tpu.memory_space<vmem>>, vector<8x32xf32>
      %17 = arith.addf %15, %16 : vector<8x32xf32>
      %cst_16 = arith.constant dense<0.000000e+00> : vector<8xf32>
      %18 = vector.multi_reduction <add>, %17, %cst_16 [1] : vector<8x32xf32> to vector<8xf32>
      %19 = vector.shape_cast %18 : vector<8xf32> to vector<8x1xf32>
      %cst_17 = arith.constant 3.200000e+01 : f32
      %20 = vector.broadcast %cst_17 : f32 to vector<8x1xf32>
      %21 = arith.divf %19, %20 : vector<8x1xf32>
      %22 = vector.broadcast %21 : vector<8x1xf32> to vector<8x32xf32>
      %23 = arith.subf %17, %22 : vector<8x32xf32>
      %24 = arith.mulf %23, %23 : vector<8x32xf32>
      %cst_18 = arith.constant dense<0.000000e+00> : vector<8xf32>
      %25 = vector.multi_reduction <add>, %24, %cst_18 [1] : vector<8x32xf32> to vector<8xf32>
      %26 = vector.shape_cast %25 : vector<8xf32> to vector<8x1xf32>
      %cst_19 = arith.constant 3.200000e+01 : f32
      %27 = vector.broadcast %cst_19 : f32 to vector<8x1xf32>
      %28 = arith.divf %26, %27 : vector<8x1xf32>
      %cst_20 = arith.constant 9.99999996E-13 : f32
      %29 = vector.broadcast %cst_20 : f32 to vector<8x1xf32>
      %30 = arith.addf %28, %29 : vector<8x1xf32>
      %31 = math.rsqrt %30 : vector<8x1xf32>
      %32 = vector.broadcast %31 : vector<8x1xf32> to vector<8x32xf32>
      %33 = arith.mulf %23, %32 : vector<8x32xf32>
      %c0_21 = arith.constant 0 : index
      %c0_22 = arith.constant 0 : index
      %34 = vector.load %arg7[%c0_21, %c0_22] : memref<1x32xf32, #tpu.memory_space<vmem>>, vector<1x32xf32>
      %35 = vector.broadcast %34 : vector<1x32xf32> to vector<8x32xf32>
      %36 = arith.mulf %33, %35 : vector<8x32xf32>
      %c0_23 = arith.constant 0 : index
      %c0_24 = arith.constant 0 : index
      %37 = vector.load %arg8[%c0_23, %c0_24] : memref<1x32xf32, #tpu.memory_space<vmem>>, vector<1x32xf32>
      %38 = vector.broadcast %37 : vector<1x32xf32> to vector<8x32xf32>
      %39 = arith.addf %36, %38 : vector<8x32xf32>
      %c0_25 = arith.constant 0 : index
      %c0_26 = arith.constant 0 : index
      %40 = vector.load %arg9[%c0_25, %c0_26] : memref<8x32xf32, #tpu.memory_space<vmem>>, vector<8x32xf32>
      tpu.vector_store %arg9[%c0_25, %c0_26], %39 {strides = array<i32>} : memref<8x32xf32, #tpu.memory_space<vmem>>, vector<8x32xf32>,
    } else {
    }
    return
  }
  func.func @transform_0(%arg0: i32, %arg1: i32, %arg2: i32) -> (i32, i32) {
    %c0_i32 = arith.constant 0 : i32
    return %arg0, %arg2 : i32, i32
  }
  func.func @transform_1(%arg0: i32, %arg1: i32, %arg2: i32) -> (i32, i32) {
    %c0_i32 = arith.constant 0 : i32
    return %arg2, %arg1 : i32, i32
  }
  func.func @transform_2(%arg0: i32, %arg1: i32, %arg2: i32) -> (i32, i32) {
    %c0_i32 = arith.constant 0 : i32
    %c0_i32_0 = arith.constant 0 : i32
    return %c0_i32, %arg1 : i32, i32
  }
  func.func @transform_3(%arg0: i32, %arg1: i32, %arg2: i32) -> (i32, i32) {
    %c0_i32 = arith.constant 0 : i32
    return %arg0, %arg1 : i32, i32
  }
  func.func @transform_4(%arg0: i32, %arg1: i32, %arg2: i32) -> (i32, i32) {
    %c0_i32 = arith.constant 0 : i32
    %c0_i32_0 = arith.constant 0 : i32
    return %c0_i32, %arg1 : i32, i32
  }
  func.func @transform_5(%arg0: i32, %arg1: i32, %arg2: i32) -> (i32, i32) {
    %c0_i32 = arith.constant 0 : i32
    %c0_i32_0 = arith.constant 0 : i32
    return %c0_i32, %arg1 : i32, i32
  }
  func.func @transform_6(%arg0: i32, %arg1: i32, %arg2: i32) -> (i32, i32) {
    %c0_i32 = arith.constant 0 : i32
    return %arg0, %arg1 : i32, i32
  }
}

module attributes {stable_mosaic.version = 11 : i64} {
  func.func @_fused_matmul_kernel(%arg0: i32, %arg1: i32, %arg2: i32, %arg3: memref<16x32xf32, #tpu.memory_space<vmem>>, %arg4: memref<32x64xbf16, #tpu.memory_space<vmem>>, %arg5: memref<1x64xf32, #tpu.memory_space<vmem>>, %arg6: memref<16x64xbf16, #tpu.memory_space<vmem>>, %arg7: memref<16x64xf32, #tpu.memory_space<vmem>>) attributes {dimension_semantics = [#tpu.dimension_semantics<parallel>, #tpu.dimension_semantics<parallel>, #tpu.dimension_semantics<arbitrary>], iteration_bounds = array<i64: 1, 1, 1>, scalar_prefetch = 0 : i64, scratch_operands = 1 : i64, tpu.core_type = #tpu.core_type<tc>, window_params = [{transform_indices = @transform_0, window_bounds = array<i64: 16, 32>}, {transform_indices = @transform_1, window_bounds = array<i64: 32, 64>}, {transform_indices = @transform_2, window_bounds = array<i64: 1, 64>}, {transform_indices = @transform_3, window_bounds = array<i64: 16, 64>}]} {
    %c0_i32 = arith.constant 0 : i32
    %0 = arith.cmpi eq, %arg2, %c0_i32 : i32
    %1 = arith.extui %0 : i1 to i32
    %c0_i32_0 = arith.constant 0 : i32
    %2 = arith.cmpi ne, %1, %c0_i32_0 : i32
    scf.if %2 {
      %cst_10 = arith.constant 0.000000e+00 : f32
      %13 = vector.broadcast %cst_10 : f32 to vector<16x64xf32>
      %c0_11 = arith.constant 0 : index
      %c0_12 = arith.constant 0 : index
      %14 = vector.load %arg7[%c0_11, %c0_12] : memref<16x64xf32, #tpu.memory_space<vmem>>, vector<16x64xf32>
      tpu.vector_store %arg7[%c0_11, %c0_12], %13 {strides = array<i32>} : memref<16x64xf32, #tpu.memory_space<vmem>>, vector<16x64xf32>,
    } else {
    }
    %c0 = arith.constant 0 : index
    %c0_1 = arith.constant 0 : index
    %3 = vector.load %arg7[%c0, %c0_1] : memref<16x64xf32, #tpu.memory_space<vmem>>, vector<16x64xf32>
    %c0_2 = arith.constant 0 : index
    %c0_3 = arith.constant 0 : index
    %4 = vector.load %arg3[%c0_2, %c0_3] : memref<16x32xf32, #tpu.memory_space<vmem>>, vector<16x32xf32>
    %5 = arith.truncf %4 : vector<16x32xf32> to vector<16x32xbf16>
    %c0_4 = arith.constant 0 : index
    %c0_5 = arith.constant 0 : index
    %6 = vector.load %arg4[%c0_4, %c0_5] : memref<32x64xbf16, #tpu.memory_space<vmem>>, vector<32x64xbf16>
    %cst = arith.constant dense<0.000000e+00> : vector<16x64xf32>
    %7 = tpu.matmul %5, %6, %cst {dimension_numbers = #tpu.dot_dimension_numbers<[1], [0], [0], [1], [0, 0, 1, 1], [], []>} : vector<16x32xbf16>, vector<32x64xbf16>, vector<16x64xf32> -> vector<16x64xf32>
    %8 = arith.addf %3, %7 : vector<16x64xf32>
    %c0_6 = arith.constant 0 : index
    %c0_7 = arith.constant 0 : index
    %9 = vector.load %arg7[%c0_6, %c0_7] : memref<16x64xf32, #tpu.memory_space<vmem>>, vector<16x64xf32>
    tpu.vector_store %arg7[%c0_6, %c0_7], %8 {strides = array<i32>} : memref<16x64xf32, #tpu.memory_space<vmem>>, vector<16x64xf32>,
    %c0_i32_8 = arith.constant 0 : i32
    %10 = arith.cmpi eq, %arg2, %c0_i32_8 : i32
    %11 = arith.extui %10 : i1 to i32
    %c0_i32_9 = arith.constant 0 : i32
    %12 = arith.cmpi ne, %11, %c0_i32_9 : i32
    scf.if %12 {
      %c0_10 = arith.constant 0 : index
      %c0_11 = arith.constant 0 : index
      %13 = vector.load %arg7[%c0_10, %c0_11] : memref<16x64xf32, #tpu.memory_space<vmem>>, vector<16x64xf32>
      %c0_12 = arith.constant 0 : index
      %c0_13 = arith.constant 0 : index
      %14 = vector.load %arg5[%c0_12, %c0_13] : memref<1x64xf32, #tpu.memory_space<vmem>>, vector<1x64xf32>
      %15 = vector.broadcast %14 : vector<1x64xf32> to vector<16x64xf32>
      %16 = arith.addf %13, %15 : vector<16x64xf32>
      %cst_14 = arith.constant 5.000000e-01 : f32
      %17 = vector.broadcast %cst_14 : f32 to vector<16x64xf32>
      %18 = arith.mulf %17, %16 : vector<16x64xf32>
      %cst_15 = arith.constant 0.707106769 : f32
      %19 = vector.broadcast %cst_15 : f32 to vector<16x64xf32>
      %20 = arith.mulf %16, %19 : vector<16x64xf32>
      %21 = math.erf %20 : vector<16x64xf32>
      %cst_16 = arith.constant 1.000000e+00 : f32
      %22 = vector.broadcast %cst_16 : f32 to vector<16x64xf32>
      %23 = arith.addf %22, %21 : vector<16x64xf32>
      %24 = arith.mulf %18, %23 : vector<16x64xf32>
      %25 = arith.truncf %24 : vector<16x64xf32> to vector<16x64xbf16>
      %c0_17 = arith.constant 0 : index
      %c0_18 = arith.constant 0 : index
      %26 = vector.load %arg6[%c0_17, %c0_18] : memref<16x64xbf16, #tpu.memory_space<vmem>>, vector<16x64xbf16>
      tpu.vector_store %arg6[%c0_17, %c0_18], %25 {strides = array<i32>} : memref<16x64xbf16, #tpu.memory_space<vmem>>, vector<16x64xbf16>,
    } else {
    }
    return
  }
  func.func @transform_0(%arg0: i32, %arg1: i32, %arg2: i32) -> (i32, i32) {
    %c0_i32 = arith.constant 0 : i32
    return %arg0, %arg2 : i32, i32
  }
  func.func @transform_1(%arg0: i32, %arg1: i32, %arg2: i32) -> (i32, i32) {
    %c0_i32 = arith.constant 0 : i32
    return %arg2, %arg1 : i32, i32
  }
  func.func @transform_2(%arg0: i32, %arg1: i32, %arg2: i32) -> (i32, i32) {
    %c0_i32 = arith.constant 0 : i32
    %c0_i32_0 = arith.constant 0 : i32
    return %c0_i32, %arg1 : i32, i32
  }
  func.func @transform_3(%arg0: i32, %arg1: i32, %arg2: i32) -> (i32, i32) {
    %c0_i32 = arith.constant 0 : i32
    return %arg0, %arg1 : i32, i32
  }
}

module attributes {stable_mosaic.version = 11 : i64} {
  func.func @_fused_matmul_kernel(%arg0: i32, %arg1: i32, %arg2: i32, %arg3: memref<8x64xbf16, #tpu.memory_space<vmem>>, %arg4: memref<64x32xbf16, #tpu.memory_space<vmem>>, %arg5: memref<1x32xf32, #tpu.memory_space<vmem>>, %arg6: memref<8x32xf32, #tpu.memory_space<vmem>>, %arg7: memref<1x32xf32, #tpu.memory_space<vmem>>, %arg8: memref<1x32xf32, #tpu.memory_space<vmem>>, %arg9: memref<8x32xf32, #tpu.memory_space<vmem>>, %arg10: memref<8x32xf32, #tpu.memory_space<vmem>>) attributes {dimension_semantics = [#tpu.dimension_semantics<parallel>, #tpu.dimension_semantics<parallel>, #tpu.dimension_semantics<arbitrary>], iteration_bounds = array<i64: 2, 1, 1>, scalar_prefetch = 0 : i64, scratch_operands = 1 : i64, tpu.core_type = #tpu.core_type<tc>, window_params = [{transform_indices = @transform_0, window_bounds = array<i64: 8, 64>}, {transform_indices = @transform_1, window_bounds = array<i64: 64, 32>}, {transform_indices = @transform_2, window_bounds = array<i64: 1, 32>}, {transform_indices = @transform_3, window_bounds = array<i64: 8, 32>}, {transform_indices = @transform_4, window_bounds = array<i64: 1, 32>}, {transform_indices = @transform_5, window_bounds = array<i64: 1, 32>}, {transform_indices = @transform_6, window_bounds = array<i64: 8, 32>}]} {
    %c0_i32 = arith.constant 0 : i32
    %0 = arith.cmpi eq, %arg2, %c0_i32 : i32
    %1 = arith.extui %0 : i1 to i32
    %c0_i32_0 = arith.constant 0 : i32
    %2 = arith.cmpi ne, %1, %c0_i32_0 : i32
    scf.if %2 {
      %cst_10 = arith.constant 0.000000e+00 : f32
      %12 = vector.broadcast %cst_10 : f32 to vector<8x32xf32>
      %c0_11 = arith.constant 0 : index
      %c0_12 = arith.constant 0 : index
      %13 = vector.load %arg10[%c0_11, %c0_12] : memref<8x32xf32, #tpu.memory_space<vmem>>, vector<8x32xf32>
      tpu.vector_store %arg10[%c0_11, %c0_12], %12 {strides = array<i32>} : memref<8x32xf32, #tpu.memory_space<vmem>>, vector<8x32xf32>,
    } else {
    }
    %c0 = arith.constant 0 : index
    %c0_1 = arith.constant 0 : index
    %3 = vector.load %arg10[%c0, %c0_1] : memref<8x32xf32, #tpu.memory_space<vmem>>, vector<8x32xf32>
    %c0_2 = arith.constant 0 : index
    %c0_3 = arith.constant 0 : index
    %4 = vector.load %arg3[%c0_2, %c0_3] : memref<8x64xbf16, #tpu.memory_space<vmem>>, vector<8x64xbf16>
    %c0_4 = arith.constant 0 : index
    %c0_5 = arith.constant 0 : index
    %5 = vector.load %arg4[%c0_4, %c0_5] : memref<64x32xbf16, #tpu.memory_space<vmem>>, vector<64x32xbf16>
    %cst = arith.constant dense<0.000000e+00> : vector<8x32xf32>
    %6 = tpu.matmul %4, %5, %cst {dimension_numbers = #tpu.dot_dimension_numbers<[1], [0], [0], [1], [0, 0, 1, 1], [], []>} : vector<8x64xbf16>, vector<64x32xbf16>, vector<8x32xf32> -> vector<8x32xf32>
    %7 = arith.addf %3, %6 : vector<8x32xf32>
    %c0_6 = arith.constant 0 : index
    %c0_7 = arith.constant 0 : index
    %8 = vector.load %arg10[%c0_6, %c0_7] : memref<8x32xf32, #tpu.memory_space<vmem>>, vector<8x32xf32>
    tpu.vector_store %arg10[%c0_6, %c0_7], %7 {strides = array<i32>} : memref<8x32xf32, #tpu.memory_space<vmem>>, vector<8x32xf32>,
    %c0_i32_8 = arith.constant 0 : i32
    %9 = arith.cmpi eq, %arg2, %c0_i32_8 : i32
    %10 = arith.extui %9 : i1 to i32
    %c0_i32_9 = arith.constant 0 : i32
    %11 = arith.cmpi ne, %10, %c0_i32_9 : i32
    scf.if %11 {
      %c0_10 = arith.constant 0 : index
      %c0_11 = arith.constant 0 : index
      %12 = vector.load %arg10[%c0_10, %c0_11] : memref<8x32xf32, #tpu.memory_space<vmem>>, vector<8x32xf32>
      %c0_12 = arith.constant 0 : index
      %c0_13 = arith.constant 0 : index
      %13 = vector.load %arg5[%c0_12, %c0_13] : memref<1x32xf32, #tpu.memory_space<vmem>>, vector<1x32xf32>
      %14 = vector.broadcast %13 : vector<1x32xf32> to vector<8x32xf32>
      %15 = arith.addf %12, %14 : vector<8x32xf32>
      %c0_14 = arith.constant 0 : index
      %c0_15 = arith.constant 0 : index
      %16 = vector.load %arg6[%c0_14, %c0_15] : memref<8x32xf32, #tpu.memory_space<vmem>>, vector<8x32xf32>
      %17 = arith.addf %15, %16 : vector<8x32xf32>
      %cst_16 = arith.constant dense<0.000000e+00> : vector<8xf32>
      %18 = vector.multi_reduction <add>, %17, %cst_16 [1] : vector<8x32xf32> to vector<8xf32>
      %19 = vector.shape_cast %18 : vector<8xf32> to vector<8x1xf32>
      %cst_17 = arith.constant 3.200000e+01 : f32
      %20 = vector.broadcast %cst_17 : f32 to vector<8x1xf32>
      %21 = arith.divf %19, %20 : vector<8x1xf32>
      %22 = vector.broadcast %21 : vector<8x1xf32> to vector<8x32xf32>
      %23 = arith.subf %17, %22 : vector<8x32xf32>
      %24 = arith.mulf %23, %23 : vector<8x32xf32>
      %cst_18 = arith.constant dense<0.000000e+00> : vector<8xf32>
      %25 = vector.multi_reduction <add>, %24, %cst_18 [1] : vector<8x32xf32> to vector<8xf32>
      %26 = vector.shape_cast %25 : vector<8xf32> to vector<8x1xf32>
      %cst_19 = arith.constant 3.200000e+01 : f32
      %27 = vector.broadcast %cst_19 : f32 to vector<8x1xf32>
      %28 = arith.divf %26, %27 : vector<8x1xf32>
      %cst_20 = arith.constant 9.99999996E-13 : f32
      %29 = vector.broadcast %cst_20 : f32 to vector<8x1xf32>
      %30 = arith.addf %28, %29 : vector<8x1xf32>
      %31 = math.rsqrt %30 : vector<8x1xf32>
      %32 = vector.broadcast %31 : vector<8x1xf32> to vector<8x32xf32>
      %33 = arith.mulf %23, %32 : vector<8x32xf32>
      %c0_21 = arith.constant 0 : index
      %c0_22 = arith.constant 0 : index
      %34 = vector.load %arg7[%c0_21, %c0_22] : memref<1x32xf32, #tpu.memory_space<vmem>>, vector<1x32xf32>
      %35 = vector.broadcast %34 : vector<1x32xf32> to vector<8x32xf32>
      %36 = arith.mulf %33, %35 : vector<8x32xf32>
      %c0_23 = arith.constant 0 : index
      %c0_24 = arith.constant 0 : index
      %37 = vector.load %arg8[%c0_23, %c0_24] : memref<1x32xf32, #tpu.memory_space<vmem>>, vector<1x32xf32>
      %38 = vector.broadcast %37 : vector<1x32xf32> to vector<8x32xf32>
      %39 = arith.addf %36, %38 : vector<8x32xf32>
      %c0_25 = arith.constant 0 : index
      %c0_26 = arith.constant 0 : index
      %40 = vector.load %arg9[%c0_25, %c0_26] : memref<8x32xf32, #tpu.memory_space<vmem>>, vector<8x32xf32>
      tpu.vector_store %arg9[%c0_25, %c0_26], %39 {strides = array<i32>} : memref<8x32xf32, #tpu.memory_space<vmem>>, vector<8x32xf32>,
    } else {
    }
    return
  }
  func.func @transform_0(%arg0: i32, %arg1: i32, %arg2: i32) -> (i32, i32) {
    %c0_i32 = arith.constant 0 : i32
    return %arg0, %arg2 : i32, i32
  }
  func.func @transform_1(%arg0: i32, %arg1: i32, %arg2: i32) -> (i32, i32) {
    %c0_i32 = arith.constant 0 : i32
    return %arg2, %arg1 : i32, i32
  }
  func.func @transform_2(%arg0: i32, %arg1: i32, %arg2: i32) -> (i32, i32) {
    %c0_i32 = arith.constant 0 : i32
    %c0_i32_0 = arith.constant 0 : i32
    return %c0_i32, %arg1 : i32, i32
  }
  func.func @transform_3(%arg0: i32, %arg1: i32, %arg2: i32) -> (i32, i32) {
    %c0_i32 = arith.constant 0 : i32
    return %arg0, %arg1 : i32, i32
  }
  func.func @transform_4(%arg0: i32, %arg1: i32, %arg2: i32) -> (i32, i32) {
    %c0_i32 = arith.constant 0 : i32
    %c0_i32_0 = arith.constant 0 : i32
    return %c0_i32, %arg1 : i32, i32
  }
  func.func @transform_5(%arg0: i32, %arg1: i32, %arg2: i32) -> (i32, i32) {
    %c0_i32 = arith.constant 0 : i32
    %c0_i32_0 = arith.constant 0 : i32
    return %c0_i32, %arg1 : i32, i32
  }
  func.func @transform_6(%arg0: i32, %arg1: i32, %arg2: i32) -> (i32, i32) {
    %c0_i32 = arith.constant 0 : i32
    return %arg0, %arg1 : i32, i32
  }
}

module attributes {stable_mosaic.version = 11 : i64} {
  func.func @_lstm_fc_kernel(%arg0: memref<2x32xf32, #tpu.memory_space<vmem>>, %arg1: memref<32x192xbf16, #tpu.memory_space<vmem>>, %arg2: memref<1x192xf32, #tpu.memory_space<vmem>>, %arg3: memref<1x64xf32, #tpu.memory_space<vmem>>, %arg4: memref<1x1xf32, #tpu.memory_space<vmem>>, %arg5: memref<2x1xf32, #tpu.memory_space<vmem>>) attributes {dimension_semantics = [], scalar_prefetch = 0 : i64, scratch_operands = 0 : i64, tpu.core_type = #tpu.core_type<tc>} {
    %c0 = arith.constant 0 : index
    %c0_0 = arith.constant 0 : index
    %0 = vector.load %arg0[%c0, %c0_0] : memref<2x32xf32, #tpu.memory_space<vmem>>, vector<2x32xf32>
    %1 = arith.truncf %0 : vector<2x32xf32> to vector<2x32xbf16>
    %c0_1 = arith.constant 0 : index
    %c0_2 = arith.constant 0 : index
    %2 = vector.load %arg1[%c0_1, %c0_2] : memref<32x192xbf16, #tpu.memory_space<vmem>>, vector<32x192xbf16>
    %cst = arith.constant dense<0.000000e+00> : vector<2x192xf32>
    %3 = tpu.matmul %1, %2, %cst {dimension_numbers = #tpu.dot_dimension_numbers<[1], [0], [0], [1], [0, 0, 1, 1], [], []>} : vector<2x32xbf16>, vector<32x192xbf16>, vector<2x192xf32> -> vector<2x192xf32>
    %c0_3 = arith.constant 0 : index
    %c0_4 = arith.constant 0 : index
    %4 = vector.load %arg2[%c0_3, %c0_4] : memref<1x192xf32, #tpu.memory_space<vmem>>, vector<1x192xf32>
    %5 = vector.broadcast %4 : vector<1x192xf32> to vector<2x192xf32>
    %6 = arith.addf %3, %5 : vector<2x192xf32>
    %7 = vector.extract_strided_slice %6 {offsets = [0, 0], sizes = [2, 32], strides = [1, 1]} : vector<2x192xf32> to vector<2x32xf32>
    %8 = arith.negf %7 : vector<2x32xf32>
    %9 = math.exp %8 : vector<2x32xf32>
    %cst_5 = arith.constant 1.000000e+00 : f32
    %10 = vector.broadcast %cst_5 : f32 to vector<2x32xf32>
    %11 = arith.addf %10, %9 : vector<2x32xf32>
    %12 = arith.divf %10, %11 : vector<2x32xf32>
    %13 = vector.extract_strided_slice %6 {offsets = [0, 32], sizes = [2, 32], strides = [1, 1]} : vector<2x192xf32> to vector<2x32xf32>
    %14 = math.tanh %13 : vector<2x32xf32>
    %15 = vector.extract_strided_slice %6 {offsets = [0, 64], sizes = [2, 32], strides = [1, 1]} : vector<2x192xf32> to vector<2x32xf32>
    %16 = arith.negf %15 : vector<2x32xf32>
    %17 = math.exp %16 : vector<2x32xf32>
    %cst_6 = arith.constant 1.000000e+00 : f32
    %18 = vector.broadcast %cst_6 : f32 to vector<2x32xf32>
    %19 = arith.addf %18, %17 : vector<2x32xf32>
    %20 = arith.divf %18, %19 : vector<2x32xf32>
    %21 = arith.mulf %12, %14 : vector<2x32xf32>
    %22 = math.tanh %21 : vector<2x32xf32>
    %23 = arith.mulf %20, %22 : vector<2x32xf32>
    %24 = vector.extract_strided_slice %6 {offsets = [0, 96], sizes = [2, 32], strides = [1, 1]} : vector<2x192xf32> to vector<2x32xf32>
    %25 = arith.negf %24 : vector<2x32xf32>
    %26 = math.exp %25 : vector<2x32xf32>
    %cst_7 = arith.constant 1.000000e+00 : f32
    %27 = vector.broadcast %cst_7 : f32 to vector<2x32xf32>
    %28 = arith.addf %27, %26 : vector<2x32xf32>
    %29 = arith.divf %27, %28 : vector<2x32xf32>
    %30 = vector.extract_strided_slice %6 {offsets = [0, 128], sizes = [2, 32], strides = [1, 1]} : vector<2x192xf32> to vector<2x32xf32>
    %31 = math.tanh %30 : vector<2x32xf32>
    %32 = vector.extract_strided_slice %6 {offsets = [0, 160], sizes = [2, 32], strides = [1, 1]} : vector<2x192xf32> to vector<2x32xf32>
    %33 = arith.negf %32 : vector<2x32xf32>
    %34 = math.exp %33 : vector<2x32xf32>
    %cst_8 = arith.constant 1.000000e+00 : f32
    %35 = vector.broadcast %cst_8 : f32 to vector<2x32xf32>
    %36 = arith.addf %35, %34 : vector<2x32xf32>
    %37 = arith.divf %35, %36 : vector<2x32xf32>
    %38 = arith.mulf %29, %31 : vector<2x32xf32>
    %39 = math.tanh %38 : vector<2x32xf32>
    %40 = arith.mulf %37, %39 : vector<2x32xf32>
    %41 = tpu.concatenate %23, %40 in 1 : vector<2x32xf32>, vector<2x32xf32> -> vector<2x64xf32>
    %c0_9 = arith.constant 0 : index
    %c0_10 = arith.constant 0 : index
    %42 = vector.load %arg3[%c0_9, %c0_10] : memref<1x64xf32, #tpu.memory_space<vmem>>, vector<1x64xf32>
    %43 = vector.broadcast %42 : vector<1x64xf32> to vector<2x64xf32>
    %44 = arith.mulf %41, %43 : vector<2x64xf32>
    %cst_11 = arith.constant dense<0.000000e+00> : vector<2xf32>
    %45 = vector.multi_reduction <add>, %44, %cst_11 [1] : vector<2x64xf32> to vector<2xf32>
    %46 = vector.shape_cast %45 : vector<2xf32> to vector<2x1xf32>
    %c0_12 = arith.constant 0 : index
    %c0_13 = arith.constant 0 : index
    %47 = vector.load %arg4[%c0_12, %c0_13] : memref<1x1xf32, #tpu.memory_space<vmem>>, vector<1x1xf32>
    %48 = vector.broadcast %47 : vector<1x1xf32> to vector<2x1xf32>
    %49 = arith.addf %46, %48 : vector<2x1xf32>
    %c0_14 = arith.constant 0 : index
    %c0_15 = arith.constant 0 : index
    %50 = vector.load %arg5[%c0_14, %c0_15] : memref<2x1xf32, #tpu.memory_space<vmem>>, vector<2x1xf32>
    tpu.vector_store %arg5[%c0_14, %c0_15], %49 {strides = array<i32>} : memref<2x1xf32, #tpu.memory_space<vmem>>, vector<2x1xf32>,
    return
  }
}

</mosaic_0001>

<bundles_post_ra>
// kernel: bert_lstm_forward.15
= control target key start
LH: loop header
LB: loop body
LE: loop exit
PB: predicated region body
PF: predicated region fallthrough
CT: control target
= control target key end

     0   :  { %s749_s21 = smov 0   ;;  %s751_s22 = smov 0   ;;  %s814_s0 = inlined_call_operand.vmem [shape: bf16[16,32], index: 0, kind: input, shape index: {}]   ;;  %s815_s1 = inlined_call_operand.vmem [shape: bf16[32,32], index: 1, kind: input, shape index: {}]   ;;  %s816_s2 = inlined_call_operand.vmem [shape: f32[1,32], index: 2, kind: input, shape index: {}]   ;;  %s817_s3 = inlined_call_operand.vmem [shape: f32[16,32], index: 3, kind: input, shape index: {}]   ;;  %s818_s4 = inlined_call_operand.vmem [shape: f32[1,32], index: 4, kind: input, shape index: {}]   ;;  %s819_s5 = inlined_call_operand.vmem [shape: f32[1,32], index: 5, kind: input, shape index: {}]   ;;  %s820_s6 = inlined_call_operand.vmem [shape: f32[16,32], index: 6, kind: output, shape index: {}]  }
   0x1   :  { %s753_s23 = smov 0  }
   0x2 LB: > { %s35_s24 = sadd.s32 1, %s706_s22  ;;  %p638_p0 = scmp.ge.s32.totalorder %s710_s23, 1  ;;  %s710_s23 = sphi %s753_s23, %s16_s23   ;;  %s706_s22 = sphi %s751_s22, %s822_s22   ;;  %s702_s21 = sphi %s749_s21, %s821_s21  }
   0x3   : > { %p37_p1 = scmp.ge.s32.totalorder %s35_s24, 2  ;;  %p291_p2 = scmp.lt.s32.totalorder %s710_s23, 3 }
   0x5   : > { %s824_s24 = smov (%p37_p1, %s35_s24), 0  ;;  %p292_p3 = pnand %p638_p0, %p291_p2 }
   0x6   : > { %p349_p4 = scmp.lt.s32.totalorder (!%p292_p3), %s702_s21, 1 }
   0x7   : > { %295 = sbr.rel (%p292_p3) target bundleno = 429 (0x1ad), region = 44 }
   0xc   : > { %v654_v0 = vld [vmem:[%s815_s1 + $0x8] sm:$0xff]  ;;  %vm393_vm0 = vcmask 261120   ;;  %v712_v1 = vmov 0.0   ;;  %v653_v2 = vld [vmem:[%s815_s1] sm:$0xff]  ;;  %s826_s21 = smov (!%p349_p4, %s702_s21), 1  ;;  %v713_v14 = vmov 32.0  }
   0xd   : > { %394 = vst.msk [vmem:[#allocation2] sm:$0xff] %vm393_vm0, %v712_v1  ;;  %423 = vmatpush.bf16.msra.mxu0 %v654_v0  ;;  %s639_s29 = sshll.u32 %s826_s21, 2  ;;  %s640_s9 = sshll.u32 %s826_s21, 3  ;;  %v681_v7 = vld [vmem:[%s816_s2] ss:$0 sm:$0xff]  ;;  %684 = vrcp.f32 %v713_v14 }
   0xe   : > { %s355_s8 = scalar_lea.vmem %s814_s0, %s639_s29  ;;  %s374_s12 = scalar_lea.vmem %s817_s3, %s640_s9  ;;  %v682_v35 = vld [vmem:[%s818_s4] ss:$0 sm:$0xff] }
   0xf   : > { %v396_v3 = vld [vmem:[%s355_s8] sm:$0xf]  ;;  %s387_s25 = scalar_lea.vmem %s820_s6, %s640_s9 }
  0x10   : > { %v441_v10 = vld [vmem:[%s374_s12] sm:$0xff] }
  0x11   : > { %424 = vmatpush.bf16.msra.mxu0 %v653_v2  ;;  %v683_v37 = vld [vmem:[%s819_s5] ss:$0 sm:$0xff] }
  0x13   : > { %v685_v15 = vpop.eup %684 }
  0x14   : > { %650 = vmatmul.msk.bf16.vlgmr.msra.gmra.mxu0 %vm393_vm0, %v396_v3  ;;  %v395_v4 = vld [vmem:[#allocation2] sm:$0xff]  ;;  %v447_v16 = vmul.f32 32.0, %v685_v15  ;;  %vm451_vm1 = vweird.f32 %v685_v15 }
  0x16   : > { %v448_v17 = vsub.f32 1.0, %v447_v16 }
  0x18   : > { %v449_v18 = vmul.f32 %v685_v15, %v448_v17 }
  0x1a   : > { %v450_v19 = vadd.f32 %v685_v15, %v449_v18 }
  0x1c   : > { %v452_v20 = vsel %vm451_vm1, %v685_v15, %v450_v19 }
  0x91   : > { %v426_v5 = vpop.f32.mrf.mxu0 }
  0x92   : > { %v430_v6 = vadd.f32 %v426_v5, %v395_v4 }
  0x94   : > { %431 = vst.msk [vmem:[#allocation2] sm:$0xff] %vm393_vm0, %v430_v6 }
  0x99   : > { %v428_v8 = vpop.f32.mrf.mxu0 }
  0x9b   : > { %v435_v9 = vld [vmem:[#allocation2] sm:$0xff] }
  0x9c   : > { %v440_v11 = vadd.f32 %v681_v7, %v435_v9 }
  0x9e   : > { %v442_v12 = vadd.f32 %v441_v10, %v440_v11 }
  0xa0   : > { %v443_v13 = vsel %vm393_vm0, %v442_v12, 0.0 }
  0xa1   : > { %444 = vadd.xlane.f32.xlu0 %v443_v13 }
 0x114   : > { %v445_v21 = vpop.xlane.xlu0 %444 }
 0x115   : > { %v453_v22 = vmul.f32 %v452_v20, %v445_v21 }
 0x117   : > { %v454_v23 = vsub.f32 %v442_v12, %v453_v22 }
 0x119   : > { %v455_v24 = vmul.f32 %v454_v23, %v454_v23 }
 0x11b   : > { %v456_v25 = vsel %vm393_vm0, %v455_v24, 0.0 }
 0x11c   : > { %457 = vadd.xlane.f32.xlu0 %v456_v25 }
 0x18f   : > { %v458_v26 = vpop.xlane.xlu0 %457 }
 0x190   : > { %v459_v27 = vmul.f32 %v458_v26, %v452_v20 }
 0x192   : > { %v460_v28 = vadd.f32 1e-12, %v459_v27 }
 0x194   : > { %686 = vrsqrt.f32 %v460_v28  ;;  %vm467_vm3 = vweird.f32 %v460_v28 }
 0x19a   : > { %v687_v29 = vpop.eup %686 }
 0x19b   : > { %v462_v30 = vmul.f32 %v687_v29, %v460_v28  ;;  %vm468_vm2 = vweird.f32 %v687_v29 }
 0x19c   : > { %vm469_vm4 = vmor %vm467_vm3, %vm468_vm2 }
 0x19d   : > { %v463_v31 = vmul.f32 %v687_v29, %v462_v30 }
 0x19f   : > { %v464_v32 = vmul.f32 0.5, %v463_v31 }
 0x1a1   : > { %v465_v33 = vsub.f32 1.5, %v464_v32 }
 0x1a3   : > { %v466_v34 = vmul.f32 %v687_v29, %v465_v33 }
 0x1a5   : > { %v470_v36 = vsel %vm469_vm4, %v687_v29, %v466_v34 }
 0x1a6   : > { %v471_v38 = vmul.f32 %v470_v36, %v454_v23 }
 0x1a8   : > { %v476_v39 = vmul.f32 %v682_v35, %v471_v38 }
 0x1aa   : > { %v481_v40 = vadd.f32 %v683_v37, %v476_v39 }
 0x1ac   : > { %482 = vst.msk [vmem:[%s387_s25] sm:$0xff] %vm393_vm0, %v481_v40 }
 0x1ad PF: > { %s16_s23 = sadd.s32 1, %s710_s23   ;;  %s821_s21 = smov %s706_s22 }
 0x1ae   : > { %p13_p5 = scmp.ge.s32.totalorder %s16_s23, 4   ;;  %s822_s22 = smov %s824_s24 }
 0x1b0   :  { %15 = sbr.rel (!%p13_p5) target bundleno = 2 (0x2), region = 97 }

// kernel: bert_lstm_forward.13
= control target key start
LH: loop header
LB: loop body
LE: loop exit
PB: predicated region body
PF: predicated region fallthrough
CT: control target
= control target key end

     0   :  { %s600_s12 = smov 0   ;;  %s602_s13 = smov 0   ;;  %s647_s0 = inlined_call_operand.vmem [shape: f32[16,32], index: 0, kind: input, shape index: {}]   ;;  %s648_s1 = inlined_call_operand.vmem [shape: bf16[3,32,32], index: 1, kind: input, shape index: {}]   ;;  %s649_s2 = inlined_call_operand.vmem [shape: f32[3,1,32], index: 2, kind: input, shape index: {}]   ;;  %s650_s3 = inlined_call_operand.vmem [shape: bf16[3,16,32], index: 3, kind: output, shape index: {}]  }
   0x1   :  { %s604_s14 = smov 0  }
   0x2 LB: > { %s39_s15 = sadd.s32 1, %s573_s13  ;;  %p509_p0 = scmp.ge.s32.totalorder %s577_s14, 1  ;;  %s577_s14 = sphi %s604_s14, %s13_s14   ;;  %s573_s13 = sphi %s602_s13, %s652_s13   ;;  %s569_s12 = sphi %s600_s12, %s651_s12  }
   0x3   : > { %p41_p1 = scmp.ge.s32.totalorder %s39_s15, 3  ;;  %p208_p2 = scmp.lt.s32.totalorder %s577_s14, 4 }
   0x5   : > { %s654_s15 = smov (%p41_p1, %s39_s15), 0  ;;  %p209_p3 = pnand %p509_p0, %p208_p2 }
   0x6   : > { %p270_p4 = scmp.lt.s32.totalorder (!%p209_p3), %s569_s12, 2 }
   0x7   : > { %212 = sbr.rel (%p209_p3) target bundleno = 172 (0xac), region = 32 }
   0xc   : > { %vm306_vm0 = vcmask 261120   ;;  %v579_v0 = vmov 0.0   ;;  %s656_s12 = smov (!%p270_p4, %s569_s12), 2  ;;  %v311_v3 = vld [vmem:[%s647_s0] sm:$0xff]  ;;  %v312_v4 = vld [vmem:[%s647_s0 + $0x8] sm:$0xff]  ;;  %vm365_vm1 = vcmask 257024  }
   0xd   : > { %307 = vst.msk [vmem:[#allocation2] sm:$0xff] %vm306_vm0, %v579_v0  ;;  %s525_s16 = sshll.u32 %s656_s12, 4  ;;  %s287_s19 = scalar_lea.vmem %s649_s2, %s656_s12  ;;  %v313_v5 = vpack.c.bf16 %v312_v4, %v311_v3 }
   0xe   : > { %308 = vst.msk [vmem:[#allocation2 + $0x8] sm:$0xff] %vm306_vm0, %v579_v0  ;;  %s280_s22 = scalar_lea.vmem %s648_s1, %s525_s16  ;;  %v554_v10 = vld [vmem:[%s287_s19] ss:$0 sm:$0xff]  ;;  %s526_s27 = sshll.u32 %s656_s12, 3 }
   0xf   : > { %v528_v1 = vld [vmem:[%s280_s22 + $0x8] sm:$0xff]  ;;  %v527_v2 = vld [vmem:[%s280_s22] sm:$0xff]  ;;  %s299_s30 = scalar_lea.vmem %s650_s3, %s526_s27 }
  0x10   : > { %340 = vmatpush.bf16.msra.mxu0 %v528_v1 }
  0x14   : > { %341 = vmatpush.bf16.msra.mxu0 %v527_v2  ;;  %v309_v6 = vld [vmem:[#allocation2] sm:$0xff] }
  0x15   : > { %v310_v9 = vld [vmem:[#allocation2 + $0x8] sm:$0xff] }
  0x17   : > { %522 = vmatmul.msk.bf16.vlgmr.msra.gmra.mxu0 %vm306_vm0, %v313_v5 }
  0x94   : > { %v343_v7 = vpop.f32.mrf.mxu0 }
  0x95   : > { %v348_v8 = vadd.f32 %v343_v7, %v309_v6 }
  0x97   : > { %350 = vst.msk [vmem:[#allocation2] sm:$0xff] %vm306_vm0, %v348_v8 }
  0x9c   : > { %v345_v11 = vpop.f32.mrf.mxu0 }
  0x9d   : > { %v349_v12 = vadd.f32 %v345_v11, %v310_v9 }
  0x9e   : > { %v355_v13 = vld [vmem:[#allocation2] sm:$0xff] }
  0x9f   : > { %v361_v14 = vadd.f32 %v554_v10, %v355_v13  ;;  %351 = vst.msk [vmem:[#allocation2 + $0x8] sm:$0xff] %vm306_vm0, %v349_v12 }
  0xa1   : > { %v363_v15 = vpack.c.bf16 %v361_v14, %v361_v14 }
  0xa3   : > { %366 = vst.msk [vmem:[%s299_s30] sm:$0xf] %vm365_vm1, %v363_v15 }
  0xa6   : > { %v356_v16 = vld [vmem:[#allocation2 + $0x8] sm:$0xff] }
  0xa7   : > { %v362_v17 = vadd.f32 %v554_v10, %v356_v16 }
  0xa9   : > { %v364_v18 = vpack.c.bf16 %v362_v17, %v362_v17 }
  0xab   : > { %367 = vst.msk [vmem:[%s299_s30 + $0x4] sm:$0xf] %vm365_vm1, %v364_v18 }
  0xac PF: > { %s13_s14 = sadd.s32 1, %s577_s14   ;;  %s651_s12 = smov %s573_s13 }
  0xad   : > { %p10_p5 = scmp.ge.s32.totalorder %s13_s14, 5   ;;  %s652_s13 = smov %s654_s15 }
  0xaf   :  { %12 = sbr.rel (!%p10_p5) target bundleno = 2 (0x2), region = 76 }

// kernel: bert_lstm_forward.12
= control target key start
LH: loop header
LB: loop body
LE: loop exit
PB: predicated region body
PF: predicated region fallthrough
CT: control target
= control target key end

     0   :  { %s314_s12 = smov 0   ;;  %s347_s0 = inlined_call_operand.vmem [shape: f32[16,32], index: 0, kind: input, shape index: {}]   ;;  %s348_s1 = inlined_call_operand.vmem [shape: f32[1,32], index: 1, kind: input, shape index: {}]   ;;  %s349_s2 = inlined_call_operand.vmem [shape: f32[1,32], index: 2, kind: input, shape index: {}]   ;;  %s350_s3 = inlined_call_operand.vmem [shape: f32[16,32], index: 3, kind: output, shape index: {}]  }
   0x1 LB: > { %s261_s13 = sadd.s32 4294967295, %s291_s12   ;;  %p265_p0 = scmp.ge.s32.totalorder %s291_s12, 1  ;;  %s291_s12 = sphi %s314_s12, %s13_s12  }
   0x2   : > { %p136_p1 = scmp.lt.s32.totalorder %s291_s12, 3 }
   0x4   : > { %p137_p2 = pnand %p265_p0, %p136_p1 }
   0x5   : > { %p158_p3 = scmp.lt.s32.totalorder (!%p137_p2), %s261_s13, 1 }
   0x6   : > { %140 = sbr.rel (%p137_p2) target bundleno = 284 (0x11c), region = 32 }
   0xb   : > { %s352_s13 = smov (!%p158_p3, %s261_s13), 1  ;;  %vm167_vm0 = vcmask 261120   ;;  %v293_v2 = vmov 32.0   ;;  %v279_v23 = vld [vmem:[%s348_s1] ss:$0 sm:$0xff] }
   0xc   : > { %s266_s14 = sshll.u32 %s352_s13, 3  ;;  %281 = vrcp.f32 %v293_v2  ;;  %v280_v25 = vld [vmem:[%s349_s2] ss:$0 sm:$0xff] }
   0xd   : > { %s161_s17 = scalar_lea.vmem %s347_s0, %s266_s14  ;;  %s165_s24 = scalar_lea.vmem %s350_s3, %s266_s14 }
   0xe   : > { %v166_v0 = vld [vmem:[%s161_s17] sm:$0xff] }
   0xf   : > { %v168_v1 = vsel %vm167_vm0, %v166_v0, 0.0 }
  0x10   : > { %169 = vadd.xlane.f32.xlu0 %v168_v1 }
  0x12   : > { %v282_v3 = vpop.eup %281 }
  0x13   : > { %v172_v4 = vmul.f32 32.0, %v282_v3  ;;  %vm176_vm1 = vweird.f32 %v282_v3 }
  0x15   : > { %v173_v5 = vsub.f32 1.0, %v172_v4 }
  0x17   : > { %v174_v6 = vmul.f32 %v282_v3, %v173_v5 }
  0x19   : > { %v175_v7 = vadd.f32 %v282_v3, %v174_v6 }
  0x1b   : > { %v177_v8 = vsel %vm176_vm1, %v282_v3, %v175_v7 }
  0x83   : > { %v170_v9 = vpop.xlane.xlu0 %169 }
  0x84   : > { %v178_v10 = vmul.f32 %v177_v8, %v170_v9 }
  0x86   : > { %v179_v11 = vsub.f32 %v166_v0, %v178_v10 }
  0x88   : > { %v180_v12 = vmul.f32 %v179_v11, %v179_v11 }
  0x8a   : > { %v181_v13 = vsel %vm167_vm0, %v180_v12, 0.0 }
  0x8b   : > { %182 = vadd.xlane.f32.xlu0 %v181_v13 }
  0xfe   : > { %v183_v14 = vpop.xlane.xlu0 %182 }
  0xff   : > { %v184_v15 = vmul.f32 %v183_v14, %v177_v8 }
 0x101   : > { %v185_v16 = vadd.f32 1e-12, %v184_v15 }
 0x103   : > { %283 = vrsqrt.f32 %v185_v16  ;;  %vm192_vm3 = vweird.f32 %v185_v16 }
 0x109   : > { %v284_v17 = vpop.eup %283 }
 0x10a   : > { %v187_v18 = vmul.f32 %v284_v17, %v185_v16  ;;  %vm193_vm2 = vweird.f32 %v284_v17 }
 0x10b   : > { %vm194_vm4 = vmor %vm192_vm3, %vm193_vm2 }
 0x10c   : > { %v188_v19 = vmul.f32 %v284_v17, %v187_v18 }
 0x10e   : > { %v189_v20 = vmul.f32 0.5, %v188_v19 }
 0x110   : > { %v190_v21 = vsub.f32 1.5, %v189_v20 }
 0x112   : > { %v191_v22 = vmul.f32 %v284_v17, %v190_v21 }
 0x114   : > { %v195_v24 = vsel %vm194_vm4, %v284_v17, %v191_v22 }
 0x115   : > { %v196_v26 = vmul.f32 %v195_v24, %v179_v11 }
 0x117   : > { %v201_v27 = vmul.f32 %v279_v23, %v196_v26 }
 0x119   : > { %v206_v28 = vadd.f32 %v280_v25, %v201_v27 }
 0x11b   : > { %207 = vst.msk [vmem:[%s165_s24] sm:$0xff] %vm167_vm0, %v206_v28 }
 0x11c PF: > { %s13_s12 = sadd.s32 1, %s291_s12  }
 0x11d   : > { %p10_p4 = scmp.ge.s32.totalorder %s13_s12, 4  }
 0x11f   :  { %12 = sbr.rel (!%p10_p4) target bundleno = 1 (0x1), region = 62 }

// kernel: bert_lstm_forward.14
= control target key start
LH: loop header
LB: loop body
LE: loop exit
PB: predicated region body
PF: predicated region fallthrough
CT: control target
= control target key end

     0   :  { %s667_s15 = smov 0   ;;  %s669_s16 = smov 0   ;;  %s724_s0 = inlined_call_operand.vmem [shape: bf16[3,2,8,32], index: 0, kind: input, shape index: {}, may-alias: {0,1,2}]   ;;  %s725_s1 = inlined_call_operand.vmem [shape: bf16[3,2,8,32], index: 1, kind: input, shape index: {}, may-alias: {0,1,2}]   ;;  %s726_s2 = inlined_call_operand.vmem [shape: bf16[3,2,8,32], index: 2, kind: input, shape index: {}, may-alias: {0,1,2}]   ;;  %s727_s3 = inlined_call_operand.vmem [shape: f32[2,1,8], index: 3, kind: input, shape index: {}]   ;;  %s728_s4 = inlined_call_operand.vmem [shape: bf16[2,8,32], index: 4, kind: output, shape index: {}]  }
   0x1   :  { %s671_s17 = smov 0  }
   0x2 LB: > { %s26_s18 = sadd.s32 1, %s634_s16  ;;  %p566_p0 = scmp.ge.s32.totalorder %s638_s17, 1  ;;  %s638_s17 = sphi %s671_s17, %s14_s17   ;;  %s634_s16 = sphi %s669_s16, %s730_s16   ;;  %s630_s15 = sphi %s667_s15, %s729_s15  }
   0x3   : > { %p28_p1 = scmp.ge.s32.totalorder %s26_s18, 2  ;;  %p218_p2 = scmp.lt.s32.totalorder %s638_s17, 3 }
   0x5   : > { %s732_s18 = smov (%p28_p1, %s26_s18), 0  ;;  %p219_p3 = pnand %p566_p0, %p218_p2 }
   0x6   : > { %p267_p4 = scmp.lt.s32.totalorder (!%p219_p3), %s630_s15, 1  ;;  %s640_s26 = smov (!%p219_p3), 112  }
   0x7   : > { %222 = sbr.rel (%p219_p3) target bundleno = 786 (0x312), region = 36  ;;  %s641_s10 = smov (!%p219_p3), 16  }
   0xc   : > { %s734_s15 = smov (!%p267_p4, %s630_s15), 1  ;;  %vm305_vm0 = vcmask 130048   ;;  %vm330_vm1 = vcmask 64512   ;;  %vm346_vm2 = vcmask 1043456   ;;  %vm364_vm3 = vcmask 125952  }
   0xd   : > { %s685_s19 = sshll.u32 %s734_s15, 2  ;;  %s292_s29 = scalar_lea.vmem %s727_s3, %s734_s15  ;;  %vm441_vm4 = vcmask 257152  }
   0xe   : > { %s500_s22 = scalar_lea.vmem %s725_s1, %s685_s19  ;;  %s273_s25 = scalar_lea.vmem %s724_s0, %s685_s19  ;;  %v607_v14 = vld [vmem:[%s292_s29] ss:$0 sm:$0xff] }
   0xf   : > { %v575_v0 = vld [vmem:[%s500_s22 + $0x8] sm:$0xf]  ;;  %v366_v2 = vld [vmem:[%s273_s25] sm:$0xf]  ;;  %s504_s6 = scalar_lea.vmem %s726_s2, %s685_s19  ;;  %s299_s9 = scalar_lea.vmem %s728_s4, %s685_s19 }
  0x10   : > { %v375_v1 = vunpack.c.l.b16 %v575_v0  ;;  %v370_v4 = vunpack.c.l.b16 %v366_v2  ;;  %v571_v6 = vld [vmem:[%s500_s22 + $0x8] sm:$0xf]  ;;  %v302_v8 = vld [vmem:[%s273_s25] sm:$0xf]  ;;  %v576_v33 = vld [vmem:[%s504_s6 + $0x10] sm:$0xf] }
  0x11   : > { %v310_v7 = vsel %vm305_vm0, %v571_v6, 0  ;;  %v413_v34 = vunpack.c.l.b16 %v576_v33  ;;  %v572_v36 = vld [vmem:[%s504_s6 + $0x10] sm:$0xf] }
  0x12   : > { %v376_v3 = vpack.c.b16 %v375_v1, %v375_v1  ;;  %v371_v5 = vpack.c.b16 %v370_v4, %v370_v4  ;;  %319 = vmatpush.bf16.xpose.msra.mxu0 %v310_v7  ;;  %v348_v37 = vsel %vm346_vm2, %v572_v36, 0 }
  0x13   : > { %v414_v35 = vpack.c.b16 %v413_v34, %v413_v34  ;;  %357 = vmatpush.bf16.msra.mxu1 %v348_v37 }
  0x14   : > { %377 = vrot.lane.b32.xlu0 %v376_v3, %s640_s26 }
  0x19   : > { %573 = vmatmul.msk.bf16.vlgmr.msra.gmra.mxu0 %vm305_vm0, %v302_v8 }
  0x1c   : > { %372 = vrot.lane.b32.xlu0 %v371_v5, %s640_s26 }
  0x86   : > { %v378_v9 = vpop.permute.xlu0 %377 }
  0x87   : > { %v383_v10 = vsel %vm305_vm0, %v378_v9, 0 }
  0x88   : > { %392 = vmatpush.bf16.xpose.msra.mxu2 %v383_v10 }
  0x8e   : > { %v373_v11 = vpop.permute.xlu0 %372 }
  0x8f   : > { %577 = vmatmul.msk.bf16.vlgmr.msra.gmra.mxu2 %vm305_vm0, %v373_v11 }
  0x96   : > { %v321_v12 = vpop.f32.mrf.mxu0 }
  0x97   : > { %v325_v18 = vmul.f32 0.25, %v321_v12 }
  0x99   : > { %v329_v20 = vadd.f32 %v607_v14, %v325_v18 }
  0x9b   : > { %v331_v22 = vsel %vm330_vm1, %v329_v20, -inf }
  0x9e   : > { %v323_v13 = vpop.f32.mrf.mxu0 }
 0x112   : > { %v394_v15 = vpop.f32.mrf.mxu2 }
 0x113   : > { %v398_v16 = vmul.f32 0.25, %v394_v15 }
 0x115   : > { %v399_v17 = vadd.f32 %v607_v14, %v398_v16 }
 0x117   : > { %v400_v19 = vsel %vm330_vm1, %v399_v17, -inf }
 0x118   : > { %401 = vmax.xlane.f32.xlu1 %v400_v19 }
 0x11a   : > { %v396_v21 = vpop.f32.mrf.mxu2 }
 0x120   : > { %332 = vmax.xlane.f32.xlu1 %v331_v22 }
 0x18b   : > { %v402_v23 = vpop.xlane.xlu1 %401 }
 0x18c   : > { %v403_v24 = vsub.f32 %v399_v17, %v402_v23 }
 0x18e   : > { %v404_v25 = vmul.f32 1.442695, %v403_v24 }
 0x190   : > { %608 = vpow2.f32 %v404_v25 }
 0x193   : > { %v333_v26 = vpop.xlane.xlu1 %332 }
 0x194   : > { %v334_v27 = vsub.f32 %v329_v20, %v333_v26 }
 0x196   : > { %v609_v28 = vpop.eup %608  ;;  %v335_v29 = vmul.f32 1.442695, %v334_v27 }
 0x197   : > { %v406_v30 = vsel %vm330_vm1, %v609_v28, 0.0 }
 0x198   : > { %610 = vpow2.f32 %v335_v29  ;;  %407 = vadd.xlane.f32.xlu2 %v406_v30 }
 0x19e   : > { %v611_v31 = vpop.eup %610 }
 0x19f   : > { %v337_v32 = vsel %vm330_vm1, %v611_v31, 0.0 }
 0x1a0   : > { %338 = vadd.xlane.f32.xlu0 %v337_v32 }
 0x1b0   : > { %415 = vrot.lane.b32.xlu2 %v414_v35, %s640_s26 }
 0x20b   : > { %v408_v38 = vpop.xlane.xlu2 %407 }
 0x20c   : > { %612 = vrcp.f32 %v408_v38 }
 0x212   : > { %v613_v39 = vpop.eup %612 }
 0x213   : > { %v416_v40 = vpop.permute.xlu2 %415  ;;  %v339_v41 = vpop.xlane.xlu0 %338  ;;  %v410_v42 = vmul.f32 %v613_v39, %v609_v28 }
 0x214   : > { %614 = vrcp.f32 %v339_v41  ;;  %v421_v43 = vsel %vm346_vm2, %v416_v40, 0 }
 0x215   : > { %430 = vmatpush.bf16.msra.mxu3 %v421_v43  ;;  %v411_v44 = vpack.c.bf16 %v410_v42, %v410_v42 }
 0x218   : > { %578 = vmatmul.msk.bf16.vlgmr.msra.gmra.mxu3 %vm330_vm1, %v411_v44 }
 0x21a   : > { %v615_v45 = vpop.eup %614 }
 0x21b   : > { %v341_v46 = vmul.f32 %v615_v45, %v611_v31 }
 0x21d   : > { %v342_v47 = vpack.c.bf16 %v341_v46, %v341_v46 }
 0x21f   : > { %574 = vmatmul.msk.bf16.vlgmr.msra.gmra.mxu1 %vm330_vm1, %v342_v47 }
 0x29b   : > { %v432_v48 = vpop.f32.mrf.mxu3 }
 0x29c   : > { %v436_v49 = vpack.c.bf16 %v432_v48, %v432_v48  ;;  %v359_v50 = vpop.f32.mrf.mxu1 }
 0x29d   : > { %v363_v51 = vpack.c.bf16 %v359_v50, %v359_v50 }
 0x29e   : > { %438 = vrot.lane.b32.xlu1 %v436_v49, %s641_s10 }
 0x29f   : > { %365 = vst.msk [vmem:[%s299_s9] sm:$0xf] %vm364_vm3, %v363_v51 }
 0x2a3   : > { %v434_v52 = vpop.f32.mrf.mxu3 }
 0x2a4   : > { %v361_v53 = vpop.f32.mrf.mxu1 }
 0x310   : > { %v439_v54 = vpop.permute.xlu1 %438 }
 0x311   : > { %442 = vst.msk [vmem:[%s299_s9] sm:$0xf] %vm441_vm4, %v439_v54 }
 0x312 PF: > { %s14_s17 = sadd.s32 1, %s638_s17   ;;  %s729_s15 = smov %s634_s16 }
 0x313   : > { %p11_p5 = scmp.ge.s32.totalorder %s14_s17, 4   ;;  %s730_s16 = smov %s732_s18 }
 0x315   :  { %13 = sbr.rel (!%p11_p5) target bundleno = 2 (0x2), region = 75 }

// kernel: bert_lstm_forward.16
= control target key start
LH: loop header
LB: loop body
LE: loop exit
PB: predicated region body
PF: predicated region fallthrough
CT: control target
= control target key end

     0   :  { %vm19_vm0 = vcmask 523264   ;;  %v193_v1 = vmov 0.0   ;;  %vm43_vm1 = vcmask 261120   ;;  %vm167_vm9 = vcmask 519168   ;;  %s252_s1 = inlined_call_operand.vmem [shape: bf16[32,64], index: 1, kind: input, shape index: {}]   ;;  %s253_s0 = inlined_call_operand.vmem [shape: f32[16,32], index: 0, kind: input, shape index: {}]   ;;  %s254_s2 = inlined_call_operand.vmem [shape: f32[1,64], index: 2, kind: input, shape index: {}]   ;;  %s255_s3 = inlined_call_operand.vmem [shape: bf16[16,64], index: 3, kind: output, shape index: {}]  }
   0x1   :  { %v186_v0 = vld [vmem:[%s252_s1 + $0x8] sm:$0xff]  ;;  %20 = vst.msk [vmem:[#allocation2] sm:$0xff] %vm19_vm0, %v193_v1  ;;  %v185_v2 = vld [vmem:[%s252_s1] sm:$0xff] }
   0x2   :  { %21 = vst.msk [vmem:[#allocation2 + $0x8] sm:$0xff] %vm19_vm0, %v193_v1  ;;  %53 = vmatpush.bf16.msra.mxu0 %v186_v0  ;;  %v24_v3 = vld [vmem:[%s253_s0] sm:$0xff]  ;;  %v25_v4 = vld [vmem:[%s253_s0 + $0x8] sm:$0xff] }
   0x3   :  { %v26_v5 = vpack.c.bf16 %v25_v4, %v24_v3  ;;  %v188_v10 = vld [vmem:[%s254_s2] ss:$0 sm:$0xff] }
   0x6   :  { %54 = vmatpush.bf16.msra.mxu0 %v185_v2 }
   0x8   :  { %v22_v6 = vld [vmem:[#allocation2] sm:$0xff] }
   0x9   :  { %182 = vmatmul.msk.bf16.vlgmr.msra.gmra.mxu0 %vm43_vm1, %v26_v5  ;;  %v23_v9 = vld [vmem:[#allocation2 + $0x8] sm:$0xff] }
  0x86   :  { %v56_v7 = vpop.f32.mrf.mxu0 }
  0x87   :  { %v61_v8 = vadd.f32 %v56_v7, %v22_v6 }
  0x89   :  { %64 = vst.msk [vmem:[#allocation2] sm:$0xff] %vm19_vm0, %v61_v8 }
  0x8e   :  { %v58_v11 = vpop.f32.mrf.mxu0 }
  0x8f   :  { %v62_v12 = vadd.f32 %v58_v11, %v23_v9 }
  0x90   :  { %v69_v13 = vld [vmem:[#allocation2] sm:$0xff] }
  0x91   :  { %v232_v14 = vadd.f32 %v188_v10, %v69_v13  ;;  %65 = vst.msk [vmem:[#allocation2 + $0x8] sm:$0xff] %vm19_vm0, %v62_v12 }
  0x93   :  { %v79_v15 = vmul.f32 0.70710677, %v232_v14 }
  0x95   :  { %v81_v16 = vmul.f32 %v79_v15, %v79_v15 }
  0x97   :  { %v82_v17 = vmin.f32 %v81_v16, 16.0 }
  0x98   :  { %v70_v18 = vld [vmem:[#allocation2 + $0x8] sm:$0xff] }
  0x99   :  { %v83_v19 = vmul.f32 2.1237322e-06, %v82_v17  ;;  %v94_v20 = vmul.f32 3.8918573e-05, %v82_v17  ;;  %v236_v21 = vadd.f32 %v188_v10, %v70_v18 }
  0x9b   :  { %v84_v22 = vadd.f32 0.00028619796, %v83_v19  ;;  %v95_v23 = vadd.f32 0.001143296, %v94_v20  ;;  %v239_v24 = vmul.f32 0.70710677, %v236_v21 }
  0x9c   :  { %v77_v20 = vmul.f32 0.5, %v232_v14  ;;  %v78_v14 = vmul.f32 0.5, %v236_v21 }
  0x9d   :  { %v85_v25 = vmul.f32 %v84_v22, %v82_v17  ;;  %v96_v26 = vmul.f32 %v95_v23, %v82_v17  ;;  %v121_v27 = vmul.f32 %v239_v24, %v239_v24 }
  0x9f   :  { %v97_v28 = vadd.f32 0.014752088, %v96_v26  ;;  %v86_v29 = vadd.f32 0.0036580483, %v85_v25  ;;  %v122_v30 = vmin.f32 %v121_v27, 16.0 }
  0xa1   :  { %v98_v31 = vmul.f32 %v97_v28, %v82_v17  ;;  %v123_v32 = vmul.f32 2.1237322e-06, %v122_v30  ;;  %v134_v33 = vmul.f32 3.8918573e-05, %v122_v30  ;;  %v87_v35 = vmul.f32 %v86_v29, %v82_v17 }
  0xa3   :  { %v99_v34 = vadd.f32 0.112945676, %v98_v31  ;;  %v124_v36 = vadd.f32 0.00028619796, %v123_v32  ;;  %v135_v37 = vadd.f32 0.001143296, %v134_v33 }
  0xa4   :  { %v88_v42 = vadd.f32 0.05243302, %v87_v35 }
  0xa5   :  { %v100_v38 = vmul.f32 %v99_v34, %v82_v17  ;;  %v125_v39 = vmul.f32 %v124_v36, %v122_v30  ;;  %v136_v40 = vmul.f32 %v135_v37, %v122_v30 }
  0xa6   :  { %v89_v48 = vmul.f32 %v88_v42, %v82_v17 }
  0xa7   :  { %v101_v41 = vadd.f32 0.4994258, %v100_v38  ;;  %v137_v43 = vadd.f32 0.014752088, %v136_v40  ;;  %v126_v45 = vadd.f32 0.0036580483, %v125_v39 }
  0xa8   :  { %v90_v52 = vadd.f32 0.18741608, %v89_v48 }
  0xa9   :  { %v102_v44 = vmul.f32 %v101_v41, %v82_v17  ;;  %v138_v46 = vmul.f32 %v137_v43, %v122_v30  ;;  %v127_v50 = vmul.f32 %v126_v45, %v122_v30 }
  0xaa   :  { %v91_v57 = vmul.f32 %v90_v52, %v82_v17 }
  0xab   :  { %v103_v47 = vadd.f32 1.0, %v102_v44  ;;  %v139_v49 = vadd.f32 0.112945676, %v138_v46  ;;  %v128_v54 = vadd.f32 0.05243302, %v127_v50 }
  0xac   :  { %v92_v63 = vadd.f32 1.1283791, %v91_v57 }
  0xad   :  { %189 = vrcp.f32 %v103_v47  ;;  %v140_v51 = vmul.f32 %v139_v49, %v122_v30  ;;  %v129_v60 = vmul.f32 %v128_v54, %v122_v30  ;;  %v115_v62 = vand.u32 2147483648, %v103_v47 }
  0xae   :  { %v113_v1 = vand.u32 2147483647, %v103_v47  ;;  %vm109_vm3 = vweird.f32 %v103_v47  ;;  %v93_v6 = vmul.f32 %v92_v63, %v79_v15 }
  0xaf   :  { %v141_v53 = vadd.f32 0.4994258, %v140_v51  ;;  %v130_v2 = vadd.f32 0.18741608, %v129_v60  ;;  %v116_v4 = vor.u32 1.1754944e-38, %v115_v62 }
  0xb0   :  { %vm114_vm5 = vcmp.eq.f32.partialorder %v113_v1, 8.507059e+37 }
  0xb1   :  { %v142_v55 = vmul.f32 %v141_v53, %v122_v30  ;;  %v131_v9 = vmul.f32 %v130_v2, %v122_v30 }
  0xb3   :  { %v190_v56 = vpop.eup %189  ;;  %v143_v59 = vadd.f32 1.0, %v142_v55  ;;  %v132_v17 = vadd.f32 1.1283791, %v131_v9 }
  0xb4   :  { %v105_v58 = vmul.f32 %v190_v56, %v103_v47  ;;  %vm110_vm2 = vweird.f32 %v190_v56 }
  0xb5   :  { %191 = vrcp.f32 %v143_v59  ;;  %vm111_vm4 = vmor %vm109_vm3, %vm110_vm2  ;;  %v155_v16 = vand.u32 2147483648, %v143_v59  ;;  %v153_v19 = vand.u32 2147483647, %v143_v59  ;;  %vm149_vm7 = vweird.f32 %v143_v59 }
  0xb6   :  { %v106_v61 = vsub.f32 1.0, %v105_v58  ;;  %v133_v26 = vmul.f32 %v132_v17, %v239_v24 }
  0xb7   :  { %v156_v15 = vor.u32 1.1754944e-38, %v155_v16  ;;  %vm154_vm10 = vcmp.eq.f32.partialorder %v153_v19, 8.507059e+37 }
  0xb8   :  { %v107_v0 = vmul.f32 %v190_v56, %v106_v61 }
  0xba   :  { %v108_v3 = vadd.f32 %v190_v56, %v107_v0 }
  0xbb   :  { %v192_v5 = vpop.eup %191 }
  0xbc   :  { %v112_v7 = vsel %vm111_vm4, %v190_v56, %v108_v3  ;;  %v145_v10 = vmul.f32 %v192_v5, %v143_v59  ;;  %vm150_vm6 = vweird.f32 %v192_v5 }
  0xbd   :  { %v117_v8 = vsel %vm114_vm5, %v116_v4, %v112_v7  ;;  %vm151_vm8 = vmor %vm149_vm7, %vm150_vm6 }
  0xbe   :  { %v118_v11 = vmul.f32 %v117_v8, %v93_v6  ;;  %v146_v12 = vsub.f32 1.0, %v145_v10 }
  0xc0   :  { %v183_v13 = vclamps-f32 %v118_v11, 1.0  ;;  %v147_v18 = vmul.f32 %v192_v5, %v146_v12 }
  0xc2   :  { %v161_v22 = vadd.f32 1.0, %v183_v13  ;;  %v148_v23 = vadd.f32 %v192_v5, %v147_v18 }
  0xc4   :  { %v163_v25 = vmul.f32 %v161_v22, %v77_v20  ;;  %v152_v27 = vsel %vm151_vm8, %v192_v5, %v148_v23 }
  0xc5   :  { %v157_v29 = vsel %vm154_vm10, %v156_v15, %v152_v27 }
  0xc6   :  { %v165_v28 = vpack.c.bf16 %v163_v25, %v163_v25  ;;  %v158_v30 = vmul.f32 %v157_v29, %v133_v26 }
  0xc8   :  { %168 = vst.msk [vmem:[%s255_s3] sm:$0xf] %vm167_vm9, %v165_v28  ;;  %v184_v31 = vclamps-f32 %v158_v30, 1.0 }
  0xca   :  { %v162_v32 = vadd.f32 1.0, %v184_v31 }
  0xcc   :  { %v164_v33 = vmul.f32 %v162_v32, %v78_v14 }
  0xce   :  { %v166_v34 = vpack.c.bf16 %v164_v33, %v164_v33 }
  0xd0   :  { %169 = vst.msk [vmem:[%s255_s3 + $0x4] sm:$0xf] %vm167_vm9, %v166_v34 }

// kernel: bert_lstm_forward.17
= control target key start
LH: loop header
LB: loop body
LE: loop exit
PB: predicated region body
PF: predicated region fallthrough
CT: control target
= control target key end

     0   :  { %s776_s21 = smov 0   ;;  %s778_s22 = smov 0   ;;  %s846_s0 = inlined_call_operand.vmem [shape: bf16[16,64], index: 0, kind: input, shape index: {}]   ;;  %s847_s1 = inlined_call_operand.vmem [shape: bf16[64,32], index: 1, kind: input, shape index: {}]   ;;  %s848_s2 = inlined_call_operand.vmem [shape: f32[1,32], index: 2, kind: input, shape index: {}]   ;;  %s849_s3 = inlined_call_operand.vmem [shape: f32[16,32], index: 3, kind: input, shape index: {}]   ;;  %s850_s4 = inlined_call_operand.vmem [shape: f32[1,32], index: 4, kind: input, shape index: {}]   ;;  %s851_s5 = inlined_call_operand.vmem [shape: f32[1,32], index: 5, kind: input, shape index: {}]   ;;  %s852_s6 = inlined_call_operand.vmem [shape: f32[16,32], index: 6, kind: output, shape index: {}]  }
   0x1   :  { %s780_s23 = smov 0  }
   0x2 LB: > { %s35_s24 = sadd.s32 1, %s733_s22  ;;  %p655_p0 = scmp.ge.s32.totalorder %s737_s23, 1  ;;  %s737_s23 = sphi %s780_s23, %s16_s23   ;;  %s733_s22 = sphi %s778_s22, %s854_s22   ;;  %s729_s21 = sphi %s776_s21, %s853_s21  }
   0x3   : > { %p37_p1 = scmp.ge.s32.totalorder %s35_s24, 2  ;;  %p291_p2 = scmp.lt.s32.totalorder %s737_s23, 3 }
   0x5   : > { %s856_s24 = smov (%p37_p1, %s35_s24), 0  ;;  %p292_p3 = pnand %p655_p0, %p291_p2 }
   0x6   : > { %p349_p4 = scmp.lt.s32.totalorder (!%p292_p3), %s729_s21, 1 }
   0x7   : > { %295 = sbr.rel (%p292_p3) target bundleno = 437 (0x1b5), region = 44 }
   0xc   : > { %v681_v0 = vld [vmem:[%s847_s1 + $0x18] sm:$0xff]  ;;  %vm393_vm0 = vcmask 261120   ;;  %v680_v1 = vld [vmem:[%s847_s1 + $0x10] sm:$0xff]  ;;  %v739_v2 = vmov 0.0   ;;  %s858_s21 = smov (!%p349_p4, %s729_s21), 1  ;;  %v679_v3 = vld [vmem:[%s847_s1 + $0x8] sm:$0xff] }
   0xd   : > { %437 = vmatpush.bf16.msra.mxu0 %v681_v0  ;;  %394 = vst.msk [vmem:[#allocation2] sm:$0xff] %vm393_vm0, %v739_v2  ;;  %s656_s7 = sshll.u32 %s858_s21, 2  ;;  %v678_v4 = vld [vmem:[%s847_s1] sm:$0xff]  ;;  %vm429_vm1 = vcmask 523264   ;;  %s657_s13 = sshll.u32 %s858_s21, 3  ;;  %v740_v16 = vmov 32.0  }
   0xe   : > { %s355_s12 = scalar_lea.vmem %s846_s0, %s656_s7  ;;  %s374_s16 = scalar_lea.vmem %s849_s3, %s657_s13  ;;  %v708_v9 = vld [vmem:[%s848_s2] ss:$0 sm:$0xff]  ;;  %711 = vrcp.f32 %v740_v16 }
   0xf   : > { %v396_v5 = vld [vmem:[%s355_s12] sm:$0xf]  ;;  %s387_s29 = scalar_lea.vmem %s852_s6, %s657_s13 }
  0x10   : > { %v458_v12 = vld [vmem:[%s374_s16] sm:$0xff] }
  0x11   : > { %438 = vmatpush.bf16.msra.mxu0 %v680_v1  ;;  %v709_v37 = vld [vmem:[%s850_s4] ss:$0 sm:$0xff] }
  0x12   : > { %v710_v39 = vld [vmem:[%s851_s5] ss:$0 sm:$0xff] }
  0x14   : > { %v395_v6 = vld [vmem:[#allocation2] sm:$0xff]  ;;  %v712_v17 = vpop.eup %711 }
  0x15   : > { %439 = vmatpush.bf16.msra.mxu0 %v679_v3  ;;  %v464_v18 = vmul.f32 32.0, %v712_v17  ;;  %vm468_vm2 = vweird.f32 %v712_v17 }
  0x17   : > { %v465_v19 = vsub.f32 1.0, %v464_v18 }
  0x19   : > { %440 = vmatpush.bf16.msra.mxu0 %v678_v4  ;;  %v466_v20 = vmul.f32 %v712_v17, %v465_v19 }
  0x1b   : > { %v467_v21 = vadd.f32 %v712_v17, %v466_v20 }
  0x1c   : > { %675 = vmatmul.msk.bf16.vlgmr.msra.gmra.mxu0 %vm429_vm1, %v396_v5 }
  0x1d   : > { %v469_v22 = vsel %vm468_vm2, %v712_v17, %v467_v21 }
  0x99   : > { %v442_v7 = vpop.f32.mrf.mxu0 }
  0x9a   : > { %v446_v8 = vadd.f32 %v442_v7, %v395_v6 }
  0x9c   : > { %448 = vst.msk [vmem:[#allocation2] sm:$0xff] %vm393_vm0, %v446_v8 }
  0xa1   : > { %v444_v10 = vpop.f32.mrf.mxu0 }
  0xa3   : > { %v452_v11 = vld [vmem:[#allocation2] sm:$0xff] }
  0xa4   : > { %v457_v13 = vadd.f32 %v708_v9, %v452_v11 }
  0xa6   : > { %v459_v14 = vadd.f32 %v458_v12, %v457_v13 }
  0xa8   : > { %v460_v15 = vsel %vm393_vm0, %v459_v14, 0.0 }
  0xa9   : > { %461 = vadd.xlane.f32.xlu0 %v460_v15 }
 0x11c   : > { %v462_v23 = vpop.xlane.xlu0 %461 }
 0x11d   : > { %v470_v24 = vmul.f32 %v469_v22, %v462_v23 }
 0x11f   : > { %v471_v25 = vsub.f32 %v459_v14, %v470_v24 }
 0x121   : > { %v472_v26 = vmul.f32 %v471_v25, %v471_v25 }
 0x123   : > { %v473_v27 = vsel %vm393_vm0, %v472_v26, 0.0 }
 0x124   : > { %474 = vadd.xlane.f32.xlu0 %v473_v27 }
 0x197   : > { %v475_v28 = vpop.xlane.xlu0 %474 }
 0x198   : > { %v476_v29 = vmul.f32 %v475_v28, %v469_v22 }
 0x19a   : > { %v477_v30 = vadd.f32 1e-12, %v476_v29 }
 0x19c   : > { %713 = vrsqrt.f32 %v477_v30  ;;  %vm484_vm4 = vweird.f32 %v477_v30 }
 0x1a2   : > { %v714_v31 = vpop.eup %713 }
 0x1a3   : > { %v479_v32 = vmul.f32 %v714_v31, %v477_v30  ;;  %vm485_vm3 = vweird.f32 %v714_v31 }
 0x1a4   : > { %vm486_vm5 = vmor %vm484_vm4, %vm485_vm3 }
 0x1a5   : > { %v480_v33 = vmul.f32 %v714_v31, %v479_v32 }
 0x1a7   : > { %v481_v34 = vmul.f32 0.5, %v480_v33 }
 0x1a9   : > { %v482_v35 = vsub.f32 1.5, %v481_v34 }
 0x1ab   : > { %v483_v36 = vmul.f32 %v714_v31, %v482_v35 }
 0x1ad   : > { %v487_v38 = vsel %vm486_vm5, %v714_v31, %v483_v36 }
 0x1ae   : > { %v488_v40 = vmul.f32 %v487_v38, %v471_v25 }
 0x1b0   : > { %v493_v41 = vmul.f32 %v709_v37, %v488_v40 }
 0x1b2   : > { %v498_v42 = vadd.f32 %v710_v39, %v493_v41 }
 0x1b4   : > { %499 = vst.msk [vmem:[%s387_s29] sm:$0xff] %vm393_vm0, %v498_v42 }
 0x1b5 PF: > { %s16_s23 = sadd.s32 1, %s737_s23   ;;  %s853_s21 = smov %s733_s22 }
 0x1b6   : > { %p13_p5 = scmp.ge.s32.totalorder %s16_s23, 4   ;;  %s854_s22 = smov %s856_s24 }
 0x1b8   :  { %15 = sbr.rel (!%p13_p5) target bundleno = 2 (0x2), region = 97 }

// kernel: bert_lstm_forward.23
= control target key start
LH: loop header
LB: loop body
LE: loop exit
PB: predicated region body
PF: predicated region fallthrough
CT: control target
= control target key end

     0   :  { %vm55_vm0 = vcmask 261120   ;;  %vm157_vm9 = vcmask 517120   ;;  %vm166_vm10 = vcmask 1024   ;;  %s290_s1 = inlined_call_operand.vmem [shape: bf16[32,192], index: 1, kind: input, shape index: {}]   ;;  %s291_s0 = inlined_call_operand.vmem [shape: f32[2,32], index: 0, kind: input, shape index: {}]   ;;  %s292_s2 = inlined_call_operand.vmem [shape: f32[1,192], index: 2, kind: input, shape index: {}]   ;;  %s293_s3 = inlined_call_operand.vmem [shape: f32[1,64], index: 3, kind: input, shape index: {}]   ;;  %s294_s4 = inlined_call_operand.<no memory space> [shape: f32[1,1], index: 4, kind: input, shape index: {}]   ;;  %s295_s5 = inlined_call_operand.vmem [shape: f32[2,1], index: 5, kind: output, shape index: {}]  }
   0x1   :  { %v182_v0 = vld [vmem:[%s290_s1 + $0x10] sm:$0xf]  ;;  %v195_v1 = vld [vmem:[%s290_s1 + $0x14] sm:$0xf0]  ;;  %v174_v2 = vld [vmem:[%s290_s1] sm:$0xf]  ;;  %v10_v49 = vstv %s294_s4 }
   0x2   :  { %v183_v3 = vor.u32 %v195_v1, %v182_v0  ;;  %v193_v4 = vld [vmem:[%s290_s1 + $0x4] sm:$0xf0]  ;;  %v194_v5 = vld [vmem:[%s290_s1 + $0x14] sm:$0xf]  ;;  %v184_v6 = vld [vmem:[%s290_s1 + $0x18] sm:$0xf0] }
   0x3   :  { %v192_v7 = vld [vmem:[%s290_s1 + $0x4] sm:$0xf]  ;;  %v176_v8 = vld [vmem:[%s290_s1 + $0x8] sm:$0xf0]  ;;  %v175_v9 = vor.u32 %v193_v4, %v174_v2  ;;  %v23_v10 = vld [vmem:[%s291_s0] sm:$0x3]  ;;  %v187_v11 = vor.u32 %v194_v5, %v184_v6 }
   0x4   :  { %65 = vmatpush.bf16.msra.mxu0 %v183_v3  ;;  %v179_v12 = vor.u32 %v192_v7, %v176_v8  ;;  %v24_v13 = vpack.c.bf16 %v23_v10, %v23_v10  ;;  %v29_v14 = vld [vmem:[%s292_s2] sm:$0x3]  ;;  %s216_s0 = smov 96   ;;  %s217_s1 = smov 64   ;;  %11 = vst [vmem:[#allocation2] sm:$0x1] %v10_v49 }
   0x5   :  { %78 = vmatpush.bf16.msra.mxu1 %v187_v11  ;;  %v31_v15 = vperm.slane %v29_v14, 0  ;;  %v32_v18 = vperm.slane %v29_v14, 1  ;;  %v198_v61 = vld [vmem:[%s293_s3] ss:$0 sm:$0xff] }
   0x8   :  { %66 = vmatpush.bf16.msra.mxu0 %v175_v9 }
   0x9   :  { %79 = vmatpush.bf16.msra.mxu1 %v179_v12 }
   0xb   :  { %188 = vmatmul.msk.bf16.vlgmr.msra.gmra.mxu0 %vm55_vm0, %v24_v13  ;;  %v199_v3 = vld [vmem:[#allocation2] ss:$0 sm:$0xff] }
   0xc   :  { %189 = vmatmul.msk.bf16.vlgmr.msra.gmra.mxu1 %vm55_vm0, %v24_v13 }
  0x88   :  { %v68_v16 = vpop.f32.mrf.mxu0 }
  0x89   :  { %v69_v17 = vadd.f32 %v68_v16, %v31_v15  ;;  %v81_v19 = vpop.f32.mrf.mxu1 }
  0x8a   :  { %v82_v20 = vadd.f32 %v81_v19, %v32_v18 }
  0x8b   :  { %200 = vtanh.f32 %v69_v17  ;;  %v190_v25 = vmul.f32 -1.442695, %v69_v17 }
  0x8c   :  { %202 = vtanh.f32 %v82_v20  ;;  %v191_v46 = vmul.f32 -1.442695, %v82_v20 }
  0x8d   :  { %204 = vpow2.f32 %v190_v25 }
  0x90   :  { %v70_v21 = vpop.f32.mrf.mxu0 }
  0x91   :  { %v201_v22 = vpop.eup %200  ;;  %v83_v23 = vpop.f32.mrf.mxu1 }
  0x92   :  { %106 = vrot.lane.b32.xlu0 %v201_v22, %s216_s0  ;;  %v203_v24 = vpop.eup %202 }
  0x93   :  { %v205_v26 = vpop.eup %204 }
  0x94   :  { %v88_v27 = vadd.f32 1.0, %v205_v26 }
  0x96   :  { %206 = vrcp.f32 %v88_v27  ;;  %v100_v33 = vand.u32 2147483648, %v88_v27  ;;  %vm94_vm2 = vweird.f32 %v88_v27  ;;  %v98_v34 = vand.u32 2147483647, %v88_v27 }
  0x98   :  { %v101_v36 = vor.u32 1.1754944e-38, %v100_v33  ;;  %vm99_vm4 = vcmp.eq.f32.partialorder %v98_v34, 8.507059e+37 }
  0x9a   :  { %137 = vrot.lane.b32.xlu0 %v203_v24, %s216_s0 }
  0x9c   :  { %v207_v28 = vpop.eup %206 }
  0x9d   :  { %v90_v29 = vmul.f32 %v207_v28, %v88_v27  ;;  %vm95_vm1 = vweird.f32 %v207_v28 }
  0x9e   :  { %vm96_vm3 = vmor %vm94_vm2, %vm95_vm1 }
  0x9f   :  { %v91_v30 = vsub.f32 1.0, %v90_v29 }
  0xa1   :  { %v92_v31 = vmul.f32 %v207_v28, %v91_v30 }
  0xa3   :  { %v93_v32 = vadd.f32 %v207_v28, %v92_v31 }
  0xa5   :  { %v97_v35 = vsel %vm96_vm3, %v207_v28, %v93_v32 }
  0xa6   :  { %v102_v38 = vsel %vm99_vm4, %v101_v36, %v97_v35 }
 0x104   :  { %v107_v37 = vpop.permute.xlu0 %106 }
 0x105   :  { %v109_v39 = vmul.f32 %v107_v37, %v102_v38 }
 0x107   :  { %208 = vtanh.f32 %v109_v39 }
 0x10c   :  { %v138_v40 = vpop.permute.xlu0 %137 }
 0x10d   :  { %v209_v41 = vpop.eup %208  ;;  %v140_v42 = vmul.f32 %v138_v40, %v102_v38 }
 0x10e   :  { %112 = vrot.lane.b32.xlu1 %v209_v41, %s217_s1 }
 0x10f   :  { %210 = vtanh.f32 %v140_v42 }
 0x110   :  { %212 = vpow2.f32 %v191_v46 }
 0x115   :  { %v211_v43 = vpop.eup %210 }
 0x116   :  { %143 = vrot.lane.b32.xlu1 %v211_v43, %s217_s1  ;;  %v213_v47 = vpop.eup %212 }
 0x117   :  { %v120_v48 = vadd.f32 1.0, %v213_v47 }
 0x119   :  { %214 = vrcp.f32 %v120_v48  ;;  %vm126_vm5 = vweird.f32 %v120_v48  ;;  %v132_v54 = vand.u32 2147483648, %v120_v48  ;;  %v130_v56 = vand.u32 2147483647, %v120_v48 }
 0x11b   :  { %v133_v57 = vor.u32 1.1754944e-38, %v132_v54  ;;  %vm131_vm8 = vcmp.eq.f32.partialorder %v130_v56, 8.507059e+37 }
 0x11f   :  { %v215_v50 = vpop.eup %214 }
 0x120   :  { %v122_v51 = vmul.f32 %v215_v50, %v120_v48  ;;  %vm127_vm6 = vweird.f32 %v215_v50 }
 0x121   :  { %vm128_vm7 = vmor %vm126_vm5, %vm127_vm6 }
 0x122   :  { %v123_v52 = vsub.f32 1.0, %v122_v51 }
 0x124   :  { %v124_v53 = vmul.f32 %v215_v50, %v123_v52 }
 0x126   :  { %v125_v55 = vadd.f32 %v215_v50, %v124_v53 }
 0x128   :  { %v129_v58 = vsel %vm128_vm7, %v215_v50, %v125_v55 }
 0x129   :  { %v134_v60 = vsel %vm131_vm8, %v133_v57, %v129_v58 }
 0x180   :  { %v113_v44 = vpop.permute.xlu1 %112 }
 0x181   :  { %v115_v45 = vmul.f32 %v113_v44, %v102_v38 }
 0x183   :  { %148 = vrot.lane.b32.xlu2 %v115_v45, %s217_s1 }
 0x188   :  { %v144_v59 = vpop.permute.xlu1 %143 }
 0x189   :  { %v146_v62 = vmul.f32 %v144_v59, %v134_v60 }
 0x1dd   :  { %v149_v63 = vpop.permute.xlu2 %148 }
 0x1de   :  { %v151_v0 = vsel %vm55_vm0, %v149_v63, %v146_v62 }
 0x1df   :  { %v156_v1 = vmul.f32 %v198_v61, %v151_v0 }
 0x1e1   :  { %v158_v2 = vsel %vm157_vm9, %v156_v1, 0.0 }
 0x1e2   :  { %159 = vadd.xlane.f32.xlu2 %v158_v2 }
 0x255   :  { %v160_v4 = vpop.xlane.xlu2 %159 }
 0x256   :  { %v165_v5 = vadd.f32 %v199_v3, %v160_v4 }
 0x258   :  { %167 = vst.msk [vmem:[%s295_s5] sm:$0x3] %vm166_vm10, %v165_v5 }

</bundles_post_ra>
